<compile_context>
chip_gen: v6e
topology: v6e:2x2x1
jax: 0.10.0
libtpu: 0.0.40
codegen_flags: <defaults>
</compile_context>

<pallas_src>
import jax
import jax.numpy as jnp
from jax import lax
from jax.experimental import pallas as pl
from jax.experimental.pallas import tpu as pltpu

LANE = 128


def _round_up(n, m):
    return ((n + m - 1) // m) * m


# ----------------------------------------------------------------------------
# Kernel: whole sequence in one invocation; time loop in-kernel, h carried as
# a loop value, everything resident in VMEM.
# ----------------------------------------------------------------------------
def gru_seq_kernel(
    xproj_ref,   # [T, B, 3*Hp] f32 : hoisted x @ [Wu1_x|Wr1_x|Wn1_x] + b1
    h0_ref,      # [B, Lp]      f32 : initial hidden state (zero-padded)
    wh_ur_ref,   # [Lp, 2*Hp]   bf16: fused h->hidden weights (update|reset)
    wh_n_ref,    # [Lp, Hp]     bf16: (h*reset)->hidden weights (new-state net)
    w2ur_ref,    # [2*Hp, 2*Lp] bf16: block-diag(w2u, w2r)
    b2ur_ref,    # [1, 2*Lp]    f32 : [b2u | b2r]
    w2n_ref,     # [Hp, Lp]     bf16
    b2n_ref,     # [1, Lp]      f32
    out_ref,     # [T, B, Lp]   f32 : hidden states for every step
):
    T = out_ref.shape[0]
    Hp = wh_n_ref.shape[1]
    Lp = w2n_ref.shape[1]

    def step(t, h):                                   # h: [B, Lp] f32
        xp = xproj_ref[t]                             # [B, 3*Hp] f32 (b1 fused)
        h_bf = h.astype(jnp.bfloat16)

        # h -> hidden (update|reset): one bf16 matmul, f32 accumulate.
        h_ur = jnp.dot(h_bf, wh_ur_ref[...],
                       preferred_element_type=jnp.float32)          # [B, 2*Hp]
        hid_ur = jnp.tanh(h_ur + xp[:, :2 * Hp])

        # Second layer for both gates in one block-diagonal matmul.
        ur = jax.nn.sigmoid(
            jnp.dot(hid_ur.astype(jnp.bfloat16), w2ur_ref[...],
                    preferred_element_type=jnp.float32) + b2ur_ref[...])
        update_gate = ur[:, :Lp]
        reset_gate = ur[:, Lp:]

        # New-state net on cat([h*r, x]) == (h*r) @ Wh_n + x_proj_n (+ b fused)
        hn = jnp.dot((h * reset_gate).astype(jnp.bfloat16), wh_n_ref[...],
                     preferred_element_type=jnp.float32)
        hid_n = jnp.tanh(hn + xp[:, 2 * Hp:])
        new_state = jnp.dot(hid_n.astype(jnp.bfloat16), w2n_ref[...],
                            preferred_element_type=jnp.float32) + b2n_ref[...]

        # (1 - u) * n + u * h  ==  n + u * (h - n)
        h_new = new_state + update_gate * (h - new_state)
        out_ref[t] = h_new
        return h_new

    lax.fori_loop(0, T, step, h0_ref[...], unroll=True)


# ----------------------------------------------------------------------------
# Parameter packing: split W1 into h/x parts, fuse across gates, zero-pad
# n_units and latent_dim up to 128 lanes, block-diag fuse the u/r second
# layer, store matmul weights in bf16. Zero padding is exact in bf16.
# ----------------------------------------------------------------------------
def prepare_params(params, input_dim, latent_dim, n_units):
    Hp = _round_up(n_units, LANE)
    Lp = _round_up(latent_dim, LANE)

    def pad_to(a, shape):
        return jnp.pad(a, [(0, s - d) for d, s in zip(a.shape, shape)])

    def split_w1(w1):
        # [L+I, H] -> h-part [Lp, Hp], x-part [I, Hp]
        return (pad_to(w1[:latent_dim], (Lp, Hp)),
                pad_to(w1[latent_dim:], (input_dim, Hp)))

    whu, wxu = split_w1(params["wu1"])
    whr, wxr = split_w1(params["wr1"])
    whn, wxn = split_w1(params["wn1"])

    w2u = pad_to(params["wu2"], (Hp, Lp))
    w2r = pad_to(params["wr2"], (Hp, Lp))
    zero = jnp.zeros((Hp, Lp), jnp.float32)

    kp = dict(
        # Used only in the wrapper for the hoisted x projection (kept f32).
        wx=jnp.concatenate([wxu, wxr, wxn], axis=1),                  # [I, 3*Hp]
        b1=jnp.concatenate([pad_to(params["bu1"], (1, Hp)),
                            pad_to(params["br1"], (1, Hp)),
                            pad_to(params["bn1"], (1, Hp))], axis=1),  # [1, 3*Hp]
        # Resident in the kernel: bf16 matmul weights, f32 biases.
        wh_ur=jnp.concatenate([whu, whr], axis=1).astype(jnp.bfloat16),     # [Lp, 2*Hp]
        wh_n=whn.astype(jnp.bfloat16),                                      # [Lp, Hp]
        w2ur=jnp.concatenate(
            [jnp.concatenate([w2u, zero], axis=1),
             jnp.concatenate([zero, w2r], axis=1)], axis=0
        ).astype(jnp.bfloat16),                                             # [2*Hp, 2*Lp]
        b2ur=jnp.concatenate([pad_to(params["bu2"], (1, Lp)),
                              pad_to(params["br2"], (1, Lp))], axis=1),     # [1, 2*Lp]
        w2n=pad_to(params["wn2"], (Hp, Lp)).astype(jnp.bfloat16),           # [Hp, Lp]
        b2n=pad_to(params["bn2"], (1, Lp)),                                 # [1, Lp]
    )
    return kp, Hp, Lp


# ----------------------------------------------------------------------------
# Wrappers
# ----------------------------------------------------------------------------
def gru_sequence(xs, h0, params):
    """Run the GRU over a whole sequence inside one kernel.

    xs: [T, B, input_dim], h0: [B, latent_dim]  ->  hs: [T, B, latent_dim]
    """
    T, B, I = xs.shape
    L = h0.shape[-1]
    n_units = params["wu2"].shape[0]
    kp, Hp, Lp = prepare_params(params, I, L, n_units)

    # Hoisted first-layer x projection + bias: one [T*B, I] @ [I, 3*Hp] matmul
    # outside the recurrence (f32).
    x_proj = jnp.einsum("tbi,ih->tbh", xs, kp["wx"],
                        preferred_element_type=jnp.float32) + kp["b1"]
    h0_p = jnp.pad(h0, ((0, 0), (0, Lp - L)))

    def vmem():
        return pl.BlockSpec(memory_space=pltpu.MemorySpace.VMEM)

    # TODO(synk): for large batches on v7x, add a leading "parallel"
    # batch-chunk grid axis so both TensorCores are used; at B=8 it is moot.
    hs_p = pl.pallas_call(
        gru_seq_kernel,
        out_shape=jax.ShapeDtypeStruct((T, B, Lp), jnp.float32),
        in_specs=[vmem() for _ in range(8)],
        out_specs=vmem(),
    )(x_proj, h0_p, kp["wh_ur"], kp["wh_n"],
      kp["w2ur"], kp["b2ur"], kp["w2n"], kp["b2n"])

    return hs_p[:, :, :L]


def gru_forward(x, h, params):
    """Single-step GRU (matches the PyTorch module's forward(x, h))."""
    return gru_sequence(x[None], h, params)[0]


# ----------------------------------------------------------------------------
# Init + pure-JAX reference (mirrors the PyTorch module)
# ----------------------------------------------------------------------------
def init_params(key, input_dim, latent_dim, n_units):
    """nn.init.normal_(weight, std=0.1), bias = 0. Weights stored [in, out]."""
    cat_dim = latent_dim + input_dim
    keys = jax.random.split(key, 6)
    p = {}
    for i, name in enumerate(["u", "r", "n"]):
        p[f"w{name}1"] = 0.1 * jax.random.normal(keys[2 * i], (cat_dim, n_units), jnp.float32)
        p[f"b{name}1"] = jnp.zeros((1, n_units), jnp.float32)
        p[f"w{name}2"] = 0.1 * jax.random.normal(keys[2 * i + 1], (n_units, latent_dim), jnp.float32)
        p[f"b{name}2"] = jnp.zeros((1, latent_dim), jnp.float32)
    return p


def gru_reference(x, h, params):
    def mlp(a, w1, b1, w2, b2):
        return jnp.dot(jnp.tanh(jnp.dot(a, w1) + b1), w2) + b2

    cat = jnp.concatenate([h, x], axis=-1)
    u = jax.nn.sigmoid(mlp(cat, params["wu1"], params["bu1"], params["wu2"], params["bu2"]))
    r = jax.nn.sigmoid(mlp(cat, params["wr1"], params["br1"], params["wr2"], params["br2"]))
    cat2 = jnp.concatenate([h * r, x], axis=-1)
    n = mlp(cat2, params["wn1"], params["bn1"], params["wn2"], params["bn2"])
    return (1.0 - u) * n + u * h


if __name__ == "__main__":
    B, INPUT_DIM, LATENT_DIM, N_UNITS, T = 8, 16, 32, 100, 6

    key = jax.random.PRNGKey(0)
    kx, kh, kp = jax.random.split(key, 3)
    xs = jax.random.normal(kx, (T, B, INPUT_DIM), jnp.float32)
    h0 = jax.random.normal(kh, (B, LATENT_DIM), jnp.float32)
    params = init_params(kp, INPUT_DIM, LATENT_DIM, N_UNITS)

    # Whole sequence through one Pallas kernel (time loop inside the kernel).
    hs = jax.block_until_ready(gru_sequence(xs, h0, params))

    # Step-by-step pure-JAX f32 reference.
    def ref_step(h, x):
        h_new = gru_reference(x, h, params)
        return h_new, h_new
    _, hs_ref = jax.lax.scan(ref_step, h0, xs)

    assert hs.shape == (T, B, LATENT_DIM), hs.shape
    max_err = float(jnp.max(jnp.abs(hs - hs_ref)))
    # bf16 matmul weights vs f32 reference -> loosened tolerance (gating/accum in f32).
    assert jnp.allclose(hs, hs_ref, atol=5e-2, rtol=5e-2), max_err

    # Single-step path (exact signature of the PyTorch module's forward).
    out1 = jax.block_until_ready(gru_forward(xs[0], h0, params))
    ref1 = gru_reference(xs[0], h0, params)
    assert out1.shape == (B, LATENT_DIM), out1.shape
    assert jnp.allclose(out1, ref1, atol=2e-2, rtol=2e-2), \
        float(jnp.max(jnp.abs(out1 - ref1)))

    print("KERNEL_OK")
</pallas_src>

<mosaic_0001>
module attributes {stable_mosaic.version = 11 : i64} {
  func.func @gru_seq_kernel(%arg0: memref<6x8x384xf32, #tpu.memory_space<vmem>>, %arg1: memref<8x128xf32, #tpu.memory_space<vmem>>, %arg2: memref<128x256xbf16, #tpu.memory_space<vmem>>, %arg3: memref<128x128xbf16, #tpu.memory_space<vmem>>, %arg4: memref<256x256xbf16, #tpu.memory_space<vmem>>, %arg5: memref<1x256xf32, #tpu.memory_space<vmem>>, %arg6: memref<128x128xbf16, #tpu.memory_space<vmem>>, %arg7: memref<1x128xf32, #tpu.memory_space<vmem>>, %arg8: memref<6x8x128xf32, #tpu.memory_space<vmem>>) attributes {dimension_semantics = [], scalar_prefetch = 0 : i64, scratch_operands = 0 : i64, tpu.core_type = #tpu.core_type<tc>} {
    %c0 = arith.constant 0 : index
    %c0_0 = arith.constant 0 : index
    %0 = vector.load %arg1[%c0, %c0_0] : memref<8x128xf32, #tpu.memory_space<vmem>>, vector<8x128xf32>
    %c0_i32 = arith.constant 0 : i32
    %1 = arith.index_cast %c0_i32 : i32 to index
    %c0_1 = arith.constant 0 : index
    %c0_2 = arith.constant 0 : index
    %2 = vector.load %arg0[%1, %c0_1, %c0_2] : memref<6x8x384xf32, #tpu.memory_space<vmem>>, vector<1x8x384xf32>
    %3 = vector.shape_cast %2 : vector<1x8x384xf32> to vector<8x384xf32>
    %4 = arith.truncf %0 : vector<8x128xf32> to vector<8x128xbf16>
    %c0_3 = arith.constant 0 : index
    %c0_4 = arith.constant 0 : index
    %5 = vector.load %arg2[%c0_3, %c0_4] : memref<128x256xbf16, #tpu.memory_space<vmem>>, vector<128x256xbf16>
    %cst = arith.constant dense<0.000000e+00> : vector<8x256xf32>
    %6 = tpu.matmul %4, %5, %cst {dimension_numbers = #tpu.dot_dimension_numbers<[1], [0], [0], [1], [0, 0, 1, 1], [], []>} : vector<8x128xbf16>, vector<128x256xbf16>, vector<8x256xf32> -> vector<8x256xf32>
    %7 = vector.extract_strided_slice %3 {offsets = [0, 0], sizes = [8, 256], strides = [1, 1]} : vector<8x384xf32> to vector<8x256xf32>
    %8 = arith.addf %6, %7 : vector<8x256xf32>
    %9 = math.tanh %8 : vector<8x256xf32>
    %10 = arith.truncf %9 : vector<8x256xf32> to vector<8x256xbf16>
    %c0_5 = arith.constant 0 : index
    %c0_6 = arith.constant 0 : index
    %11 = vector.load %arg4[%c0_5, %c0_6] : memref<256x256xbf16, #tpu.memory_space<vmem>>, vector<256x256xbf16>
    %cst_7 = arith.constant dense<0.000000e+00> : vector<8x256xf32>
    %12 = tpu.matmul %10, %11, %cst_7 {dimension_numbers = #tpu.dot_dimension_numbers<[1], [0], [0], [1], [0, 0, 1, 1], [], []>} : vector<8x256xbf16>, vector<256x256xbf16>, vector<8x256xf32> -> vector<8x256xf32>
    %c0_8 = arith.constant 0 : index
    %c0_9 = arith.constant 0 : index
    %13 = vector.load %arg5[%c0_8, %c0_9] : memref<1x256xf32, #tpu.memory_space<vmem>>, vector<1x256xf32>
    %14 = vector.broadcast %13 : vector<1x256xf32> to vector<8x256xf32>
    %15 = arith.addf %12, %14 : vector<8x256xf32>
    %16 = arith.negf %15 : vector<8x256xf32>
    %17 = math.exp %16 : vector<8x256xf32>
    %cst_10 = arith.constant 1.000000e+00 : f32
    %18 = vector.broadcast %cst_10 : f32 to vector<8x256xf32>
    %19 = arith.addf %18, %17 : vector<8x256xf32>
    %20 = arith.divf %18, %19 : vector<8x256xf32>
    %21 = vector.extract_strided_slice %20 {offsets = [0, 0], sizes = [8, 128], strides = [1, 1]} : vector<8x256xf32> to vector<8x128xf32>
    %22 = vector.extract_strided_slice %20 {offsets = [0, 128], sizes = [8, 128], strides = [1, 1]} : vector<8x256xf32> to vector<8x128xf32>
    %23 = arith.mulf %0, %22 : vector<8x128xf32>
    %24 = arith.truncf %23 : vector<8x128xf32> to vector<8x128xbf16>
    %c0_11 = arith.constant 0 : index
    %c0_12 = arith.constant 0 : index
    %25 = vector.load %arg3[%c0_11, %c0_12] : memref<128x128xbf16, #tpu.memory_space<vmem>>, vector<128x128xbf16>
    %cst_13 = arith.constant dense<0.000000e+00> : vector<8x128xf32>
    %26 = tpu.matmul %24, %25, %cst_13 {dimension_numbers = #tpu.dot_dimension_numbers<[1], [0], [0], [1], [0, 0, 1, 1], [], []>} : vector<8x128xbf16>, vector<128x128xbf16>, vector<8x128xf32> -> vector<8x128xf32>
    %27 = vector.extract_strided_slice %3 {offsets = [0, 256], sizes = [8, 128], strides = [1, 1]} : vector<8x384xf32> to vector<8x128xf32>
    %28 = arith.addf %26, %27 : vector<8x128xf32>
    %29 = math.tanh %28 : vector<8x128xf32>
    %30 = arith.truncf %29 : vector<8x128xf32> to vector<8x128xbf16>
    %c0_14 = arith.constant 0 : index
    %c0_15 = arith.constant 0 : index
    %31 = vector.load %arg6[%c0_14, %c0_15] : memref<128x128xbf16, #tpu.memory_space<vmem>>, vector<128x128xbf16>
    %cst_16 = arith.constant dense<0.000000e+00> : vector<8x128xf32>
    %32 = tpu.matmul %30, %31, %cst_16 {dimension_numbers = #tpu.dot_dimension_numbers<[1], [0], [0], [1], [0, 0, 1, 1], [], []>} : vector<8x128xbf16>, vector<128x128xbf16>, vector<8x128xf32> -> vector<8x128xf32>
    %c0_17 = arith.constant 0 : index
    %c0_18 = arith.constant 0 : index
    %33 = vector.load %arg7[%c0_17, %c0_18] : memref<1x128xf32, #tpu.memory_space<vmem>>, vector<1x128xf32>
    %34 = vector.broadcast %33 : vector<1x128xf32> to vector<8x128xf32>
    %35 = arith.addf %32, %34 : vector<8x128xf32>
    %36 = arith.subf %0, %35 : vector<8x128xf32>
    %37 = arith.mulf %21, %36 : vector<8x128xf32>
    %38 = arith.addf %35, %37 : vector<8x128xf32>
    %39 = arith.index_cast %c0_i32 : i32 to index
    %c0_19 = arith.constant 0 : index
    %c0_20 = arith.constant 0 : index
    %40 = vector.load %arg8[%39, %c0_19, %c0_20] : memref<6x8x128xf32, #tpu.memory_space<vmem>>, vector<1x8x128xf32>
    %41 = vector.shape_cast %40 : vector<1x8x128xf32> to vector<8x128xf32>
    %42 = vector.shape_cast %38 : vector<8x128xf32> to vector<1x8x128xf32>
    tpu.vector_store %arg8[%39, %c0_19, %c0_20], %42 {strides = array<i32>} : memref<6x8x128xf32, #tpu.memory_space<vmem>>, vector<1x8x128xf32>,
    %c1_i32 = arith.constant 1 : i32
    %43 = arith.index_cast %c1_i32 : i32 to index
    %c0_21 = arith.constant 0 : index
    %c0_22 = arith.constant 0 : index
    %44 = vector.load %arg0[%43, %c0_21, %c0_22] : memref<6x8x384xf32, #tpu.memory_space<vmem>>, vector<1x8x384xf32>
    %45 = vector.shape_cast %44 : vector<1x8x384xf32> to vector<8x384xf32>
    %46 = arith.truncf %38 : vector<8x128xf32> to vector<8x128xbf16>
    %c0_23 = arith.constant 0 : index
    %c0_24 = arith.constant 0 : index
    %47 = vector.load %arg2[%c0_23, %c0_24] : memref<128x256xbf16, #tpu.memory_space<vmem>>, vector<128x256xbf16>
    %cst_25 = arith.constant dense<0.000000e+00> : vector<8x256xf32>
    %48 = tpu.matmul %46, %47, %cst_25 {dimension_numbers = #tpu.dot_dimension_numbers<[1], [0], [0], [1], [0, 0, 1, 1], [], []>} : vector<8x128xbf16>, vector<128x256xbf16>, vector<8x256xf32> -> vector<8x256xf32>
    %49 = vector.extract_strided_slice %45 {offsets = [0, 0], sizes = [8, 256], strides = [1, 1]} : vector<8x384xf32> to vector<8x256xf32>
    %50 = arith.addf %48, %49 : vector<8x256xf32>
    %51 = math.tanh %50 : vector<8x256xf32>
    %52 = arith.truncf %51 : vector<8x256xf32> to vector<8x256xbf16>
    %c0_26 = arith.constant 0 : index
    %c0_27 = arith.constant 0 : index
    %53 = vector.load %arg4[%c0_26, %c0_27] : memref<256x256xbf16, #tpu.memory_space<vmem>>, vector<256x256xbf16>
    %cst_28 = arith.constant dense<0.000000e+00> : vector<8x256xf32>
    %54 = tpu.matmul %52, %53, %cst_28 {dimension_numbers = #tpu.dot_dimension_numbers<[1], [0], [0], [1], [0, 0, 1, 1], [], []>} : vector<8x256xbf16>, vector<256x256xbf16>, vector<8x256xf32> -> vector<8x256xf32>
    %c0_29 = arith.constant 0 : index
    %c0_30 = arith.constant 0 : index
    %55 = vector.load %arg5[%c0_29, %c0_30] : memref<1x256xf32, #tpu.memory_space<vmem>>, vector<1x256xf32>
    %56 = vector.broadcast %55 : vector<1x256xf32> to vector<8x256xf32>
    %57 = arith.addf %54, %56 : vector<8x256xf32>
    %58 = arith.negf %57 : vector<8x256xf32>
    %59 = math.exp %58 : vector<8x256xf32>
    %cst_31 = arith.constant 1.000000e+00 : f32
    %60 = vector.broadcast %cst_31 : f32 to vector<8x256xf32>
    %61 = arith.addf %60, %59 : vector<8x256xf32>
    %62 = arith.divf %60, %61 : vector<8x256xf32>
    %63 = vector.extract_strided_slice %62 {offsets = [0, 0], sizes = [8, 128], strides = [1, 1]} : vector<8x256xf32> to vector<8x128xf32>
    %64 = vector.extract_strided_slice %62 {offsets = [0, 128], sizes = [8, 128], strides = [1, 1]} : vector<8x256xf32> to vector<8x128xf32>
    %65 = arith.mulf %38, %64 : vector<8x128xf32>
    %66 = arith.truncf %65 : vector<8x128xf32> to vector<8x128xbf16>
    %c0_32 = arith.constant 0 : index
    %c0_33 = arith.constant 0 : index
    %67 = vector.load %arg3[%c0_32, %c0_33] : memref<128x128xbf16, #tpu.memory_space<vmem>>, vector<128x128xbf16>
    %cst_34 = arith.constant dense<0.000000e+00> : vector<8x128xf32>
    %68 = tpu.matmul %66, %67, %cst_34 {dimension_numbers = #tpu.dot_dimension_numbers<[1], [0], [0], [1], [0, 0, 1, 1], [], []>} : vector<8x128xbf16>, vector<128x128xbf16>, vector<8x128xf32> -> vector<8x128xf32>
    %69 = vector.extract_strided_slice %45 {offsets = [0, 256], sizes = [8, 128], strides = [1, 1]} : vector<8x384xf32> to vector<8x128xf32>
    %70 = arith.addf %68, %69 : vector<8x128xf32>
    %71 = math.tanh %70 : vector<8x128xf32>
    %72 = arith.truncf %71 : vector<8x128xf32> to vector<8x128xbf16>
    %c0_35 = arith.constant 0 : index
    %c0_36 = arith.constant 0 : index
    %73 = vector.load %arg6[%c0_35, %c0_36] : memref<128x128xbf16, #tpu.memory_space<vmem>>, vector<128x128xbf16>
    %cst_37 = arith.constant dense<0.000000e+00> : vector<8x128xf32>
    %74 = tpu.matmul %72, %73, %cst_37 {dimension_numbers = #tpu.dot_dimension_numbers<[1], [0], [0], [1], [0, 0, 1, 1], [], []>} : vector<8x128xbf16>, vector<128x128xbf16>, vector<8x128xf32> -> vector<8x128xf32>
    %c0_38 = arith.constant 0 : index
    %c0_39 = arith.constant 0 : index
    %75 = vector.load %arg7[%c0_38, %c0_39] : memref<1x128xf32, #tpu.memory_space<vmem>>, vector<1x128xf32>
    %76 = vector.broadcast %75 : vector<1x128xf32> to vector<8x128xf32>
    %77 = arith.addf %74, %76 : vector<8x128xf32>
    %78 = arith.subf %38, %77 : vector<8x128xf32>
    %79 = arith.mulf %63, %78 : vector<8x128xf32>
    %80 = arith.addf %77, %79 : vector<8x128xf32>
    %81 = arith.index_cast %c1_i32 : i32 to index
    %c0_40 = arith.constant 0 : index
    %c0_41 = arith.constant 0 : index
    %82 = vector.load %arg8[%81, %c0_40, %c0_41] : memref<6x8x128xf32, #tpu.memory_space<vmem>>, vector<1x8x128xf32>
    %83 = vector.shape_cast %82 : vector<1x8x128xf32> to vector<8x128xf32>
    %84 = vector.shape_cast %80 : vector<8x128xf32> to vector<1x8x128xf32>
    tpu.vector_store %arg8[%81, %c0_40, %c0_41], %84 {strides = array<i32>} : memref<6x8x128xf32, #tpu.memory_space<vmem>>, vector<1x8x128xf32>,
    %c2_i32 = arith.constant 2 : i32
    %85 = arith.index_cast %c2_i32 : i32 to index
    %c0_42 = arith.constant 0 : index
    %c0_43 = arith.constant 0 : index
    %86 = vector.load %arg0[%85, %c0_42, %c0_43] : memref<6x8x384xf32, #tpu.memory_space<vmem>>, vector<1x8x384xf32>
    %87 = vector.shape_cast %86 : vector<1x8x384xf32> to vector<8x384xf32>
    %88 = arith.truncf %80 : vector<8x128xf32> to vector<8x128xbf16>
    %c0_44 = arith.constant 0 : index
    %c0_45 = arith.constant 0 : index
    %89 = vector.load %arg2[%c0_44, %c0_45] : memref<128x256xbf16, #tpu.memory_space<vmem>>, vector<128x256xbf16>
    %cst_46 = arith.constant dense<0.000000e+00> : vector<8x256xf32>
    %90 = tpu.matmul %88, %89, %cst_46 {dimension_numbers = #tpu.dot_dimension_numbers<[1], [0], [0], [1], [0, 0, 1, 1], [], []>} : vector<8x128xbf16>, vector<128x256xbf16>, vector<8x256xf32> -> vector<8x256xf32>
    %91 = vector.extract_strided_slice %87 {offsets = [0, 0], sizes = [8, 256], strides = [1, 1]} : vector<8x384xf32> to vector<8x256xf32>
    %92 = arith.addf %90, %91 : vector<8x256xf32>
    %93 = math.tanh %92 : vector<8x256xf32>
    %94 = arith.truncf %93 : vector<8x256xf32> to vector<8x256xbf16>
    %c0_47 = arith.constant 0 : index
    %c0_48 = arith.constant 0 : index
    %95 = vector.load %arg4[%c0_47, %c0_48] : memref<256x256xbf16, #tpu.memory_space<vmem>>, vector<256x256xbf16>
    %cst_49 = arith.constant dense<0.000000e+00> : vector<8x256xf32>
    %96 = tpu.matmul %94, %95, %cst_49 {dimension_numbers = #tpu.dot_dimension_numbers<[1], [0], [0], [1], [0, 0, 1, 1], [], []>} : vector<8x256xbf16>, vector<256x256xbf16>, vector<8x256xf32> -> vector<8x256xf32>
    %c0_50 = arith.constant 0 : index
    %c0_51 = arith.constant 0 : index
    %97 = vector.load %arg5[%c0_50, %c0_51] : memref<1x256xf32, #tpu.memory_space<vmem>>, vector<1x256xf32>
    %98 = vector.broadcast %97 : vector<1x256xf32> to vector<8x256xf32>
    %99 = arith.addf %96, %98 : vector<8x256xf32>
    %100 = arith.negf %99 : vector<8x256xf32>
    %101 = math.exp %100 : vector<8x256xf32>
    %cst_52 = arith.constant 1.000000e+00 : f32
    %102 = vector.broadcast %cst_52 : f32 to vector<8x256xf32>
    %103 = arith.addf %102, %101 : vector<8x256xf32>
    %104 = arith.divf %102, %103 : vector<8x256xf32>
    %105 = vector.extract_strided_slice %104 {offsets = [0, 0], sizes = [8, 128], strides = [1, 1]} : vector<8x256xf32> to vector<8x128xf32>
    %106 = vector.extract_strided_slice %104 {offsets = [0, 128], sizes = [8, 128], strides = [1, 1]} : vector<8x256xf32> to vector<8x128xf32>
    %107 = arith.mulf %80, %106 : vector<8x128xf32>
    %108 = arith.truncf %107 : vector<8x128xf32> to vector<8x128xbf16>
    %c0_53 = arith.constant 0 : index
    %c0_54 = arith.constant 0 : index
    %109 = vector.load %arg3[%c0_53, %c0_54] : memref<128x128xbf16, #tpu.memory_space<vmem>>, vector<128x128xbf16>
    %cst_55 = arith.constant dense<0.000000e+00> : vector<8x128xf32>
    %110 = tpu.matmul %108, %109, %cst_55 {dimension_numbers = #tpu.dot_dimension_numbers<[1], [0], [0], [1], [0, 0, 1, 1], [], []>} : vector<8x128xbf16>, vector<128x128xbf16>, vector<8x128xf32> -> vector<8x128xf32>
    %111 = vector.extract_strided_slice %87 {offsets = [0, 256], sizes = [8, 128], strides = [1, 1]} : vector<8x384xf32> to vector<8x128xf32>
    %112 = arith.addf %110, %111 : vector<8x128xf32>
    %113 = math.tanh %112 : vector<8x128xf32>
    %114 = arith.truncf %113 : vector<8x128xf32> to vector<8x128xbf16>
    %c0_56 = arith.constant 0 : index
    %c0_57 = arith.constant 0 : index
    %115 = vector.load %arg6[%c0_56, %c0_57] : memref<128x128xbf16, #tpu.memory_space<vmem>>, vector<128x128xbf16>
    %cst_58 = arith.constant dense<0.000000e+00> : vector<8x128xf32>
    %116 = tpu.matmul %114, %115, %cst_58 {dimension_numbers = #tpu.dot_dimension_numbers<[1], [0], [0], [1], [0, 0, 1, 1], [], []>} : vector<8x128xbf16>, vector<128x128xbf16>, vector<8x128xf32> -> vector<8x128xf32>
    %c0_59 = arith.constant 0 : index
    %c0_60 = arith.constant 0 : index
    %117 = vector.load %arg7[%c0_59, %c0_60] : memref<1x128xf32, #tpu.memory_space<vmem>>, vector<1x128xf32>
    %118 = vector.broadcast %117 : vector<1x128xf32> to vector<8x128xf32>
    %119 = arith.addf %116, %118 : vector<8x128xf32>
    %120 = arith.subf %80, %119 : vector<8x128xf32>
    %121 = arith.mulf %105, %120 : vector<8x128xf32>
    %122 = arith.addf %119, %121 : vector<8x128xf32>
    %123 = arith.index_cast %c2_i32 : i32 to index
    %c0_61 = arith.constant 0 : index
    %c0_62 = arith.constant 0 : index
    %124 = vector.load %arg8[%123, %c0_61, %c0_62] : memref<6x8x128xf32, #tpu.memory_space<vmem>>, vector<1x8x128xf32>
    %125 = vector.shape_cast %124 : vector<1x8x128xf32> to vector<8x128xf32>
    %126 = vector.shape_cast %122 : vector<8x128xf32> to vector<1x8x128xf32>
    tpu.vector_store %arg8[%123, %c0_61, %c0_62], %126 {strides = array<i32>} : memref<6x8x128xf32, #tpu.memory_space<vmem>>, vector<1x8x128xf32>,
    %c3_i32 = arith.constant 3 : i32
    %127 = arith.index_cast %c3_i32 : i32 to index
    %c0_63 = arith.constant 0 : index
    %c0_64 = arith.constant 0 : index
    %128 = vector.load %arg0[%127, %c0_63, %c0_64] : memref<6x8x384xf32, #tpu.memory_space<vmem>>, vector<1x8x384xf32>
    %129 = vector.shape_cast %128 : vector<1x8x384xf32> to vector<8x384xf32>
    %130 = arith.truncf %122 : vector<8x128xf32> to vector<8x128xbf16>
    %c0_65 = arith.constant 0 : index
    %c0_66 = arith.constant 0 : index
    %131 = vector.load %arg2[%c0_65, %c0_66] : memref<128x256xbf16, #tpu.memory_space<vmem>>, vector<128x256xbf16>
    %cst_67 = arith.constant dense<0.000000e+00> : vector<8x256xf32>
    %132 = tpu.matmul %130, %131, %cst_67 {dimension_numbers = #tpu.dot_dimension_numbers<[1], [0], [0], [1], [0, 0, 1, 1], [], []>} : vector<8x128xbf16>, vector<128x256xbf16>, vector<8x256xf32> -> vector<8x256xf32>
    %133 = vector.extract_strided_slice %129 {offsets = [0, 0], sizes = [8, 256], strides = [1, 1]} : vector<8x384xf32> to vector<8x256xf32>
    %134 = arith.addf %132, %133 : vector<8x256xf32>
    %135 = math.tanh %134 : vector<8x256xf32>
    %136 = arith.truncf %135 : vector<8x256xf32> to vector<8x256xbf16>
    %c0_68 = arith.constant 0 : index
    %c0_69 = arith.constant 0 : index
    %137 = vector.load %arg4[%c0_68, %c0_69] : memref<256x256xbf16, #tpu.memory_space<vmem>>, vector<256x256xbf16>
    %cst_70 = arith.constant dense<0.000000e+00> : vector<8x256xf32>
    %138 = tpu.matmul %136, %137, %cst_70 {dimension_numbers = #tpu.dot_dimension_numbers<[1], [0], [0], [1], [0, 0, 1, 1], [], []>} : vector<8x256xbf16>, vector<256x256xbf16>, vector<8x256xf32> -> vector<8x256xf32>
    %c0_71 = arith.constant 0 : index
    %c0_72 = arith.constant 0 : index
    %139 = vector.load %arg5[%c0_71, %c0_72] : memref<1x256xf32, #tpu.memory_space<vmem>>, vector<1x256xf32>
    %140 = vector.broadcast %139 : vector<1x256xf32> to vector<8x256xf32>
    %141 = arith.addf %138, %140 : vector<8x256xf32>
    %142 = arith.negf %141 : vector<8x256xf32>
    %143 = math.exp %142 : vector<8x256xf32>
    %cst_73 = arith.constant 1.000000e+00 : f32
    %144 = vector.broadcast %cst_73 : f32 to vector<8x256xf32>
    %145 = arith.addf %144, %143 : vector<8x256xf32>
    %146 = arith.divf %144, %145 : vector<8x256xf32>
    %147 = vector.extract_strided_slice %146 {offsets = [0, 0], sizes = [8, 128], strides = [1, 1]} : vector<8x256xf32> to vector<8x128xf32>
    %148 = vector.extract_strided_slice %146 {offsets = [0, 128], sizes = [8, 128], strides = [1, 1]} : vector<8x256xf32> to vector<8x128xf32>
    %149 = arith.mulf %122, %148 : vector<8x128xf32>
    %150 = arith.truncf %149 : vector<8x128xf32> to vector<8x128xbf16>
    %c0_74 = arith.constant 0 : index
    %c0_75 = arith.constant 0 : index
    %151 = vector.load %arg3[%c0_74, %c0_75] : memref<128x128xbf16, #tpu.memory_space<vmem>>, vector<128x128xbf16>
    %cst_76 = arith.constant dense<0.000000e+00> : vector<8x128xf32>
    %152 = tpu.matmul %150, %151, %cst_76 {dimension_numbers = #tpu.dot_dimension_numbers<[1], [0], [0], [1], [0, 0, 1, 1], [], []>} : vector<8x128xbf16>, vector<128x128xbf16>, vector<8x128xf32> -> vector<8x128xf32>
    %153 = vector.extract_strided_slice %129 {offsets = [0, 256], sizes = [8, 128], strides = [1, 1]} : vector<8x384xf32> to vector<8x128xf32>
    %154 = arith.addf %152, %153 : vector<8x128xf32>
    %155 = math.tanh %154 : vector<8x128xf32>
    %156 = arith.truncf %155 : vector<8x128xf32> to vector<8x128xbf16>
    %c0_77 = arith.constant 0 : index
    %c0_78 = arith.constant 0 : index
    %157 = vector.load %arg6[%c0_77, %c0_78] : memref<128x128xbf16, #tpu.memory_space<vmem>>, vector<128x128xbf16>
    %cst_79 = arith.constant dense<0.000000e+00> : vector<8x128xf32>
    %158 = tpu.matmul %156, %157, %cst_79 {dimension_numbers = #tpu.dot_dimension_numbers<[1], [0], [0], [1], [0, 0, 1, 1], [], []>} : vector<8x128xbf16>, vector<128x128xbf16>, vector<8x128xf32> -> vector<8x128xf32>
    %c0_80 = arith.constant 0 : index
    %c0_81 = arith.constant 0 : index
    %159 = vector.load %arg7[%c0_80, %c0_81] : memref<1x128xf32, #tpu.memory_space<vmem>>, vector<1x128xf32>
    %160 = vector.broadcast %159 : vector<1x128xf32> to vector<8x128xf32>
    %161 = arith.addf %158, %160 : vector<8x128xf32>
    %162 = arith.subf %122, %161 : vector<8x128xf32>
    %163 = arith.mulf %147, %162 : vector<8x128xf32>
    %164 = arith.addf %161, %163 : vector<8x128xf32>
    %165 = arith.index_cast %c3_i32 : i32 to index
    %c0_82 = arith.constant 0 : index
    %c0_83 = arith.constant 0 : index
    %166 = vector.load %arg8[%165, %c0_82, %c0_83] : memref<6x8x128xf32, #tpu.memory_space<vmem>>, vector<1x8x128xf32>
    %167 = vector.shape_cast %166 : vector<1x8x128xf32> to vector<8x128xf32>
    %168 = vector.shape_cast %164 : vector<8x128xf32> to vector<1x8x128xf32>
    tpu.vector_store %arg8[%165, %c0_82, %c0_83], %168 {strides = array<i32>} : memref<6x8x128xf32, #tpu.memory_space<vmem>>, vector<1x8x128xf32>,
    %c4_i32 = arith.constant 4 : i32
    %169 = arith.index_cast %c4_i32 : i32 to index
    %c0_84 = arith.constant 0 : index
    %c0_85 = arith.constant 0 : index
    %170 = vector.load %arg0[%169, %c0_84, %c0_85] : memref<6x8x384xf32, #tpu.memory_space<vmem>>, vector<1x8x384xf32>
    %171 = vector.shape_cast %170 : vector<1x8x384xf32> to vector<8x384xf32>
    %172 = arith.truncf %164 : vector<8x128xf32> to vector<8x128xbf16>
    %c0_86 = arith.constant 0 : index
    %c0_87 = arith.constant 0 : index
    %173 = vector.load %arg2[%c0_86, %c0_87] : memref<128x256xbf16, #tpu.memory_space<vmem>>, vector<128x256xbf16>
    %cst_88 = arith.constant dense<0.000000e+00> : vector<8x256xf32>
    %174 = tpu.matmul %172, %173, %cst_88 {dimension_numbers = #tpu.dot_dimension_numbers<[1], [0], [0], [1], [0, 0, 1, 1], [], []>} : vector<8x128xbf16>, vector<128x256xbf16>, vector<8x256xf32> -> vector<8x256xf32>
    %175 = vector.extract_strided_slice %171 {offsets = [0, 0], sizes = [8, 256], strides = [1, 1]} : vector<8x384xf32> to vector<8x256xf32>
    %176 = arith.addf %174, %175 : vector<8x256xf32>
    %177 = math.tanh %176 : vector<8x256xf32>
    %178 = arith.truncf %177 : vector<8x256xf32> to vector<8x256xbf16>
    %c0_89 = arith.constant 0 : index
    %c0_90 = arith.constant 0 : index
    %179 = vector.load %arg4[%c0_89, %c0_90] : memref<256x256xbf16, #tpu.memory_space<vmem>>, vector<256x256xbf16>
    %cst_91 = arith.constant dense<0.000000e+00> : vector<8x256xf32>
    %180 = tpu.matmul %178, %179, %cst_91 {dimension_numbers = #tpu.dot_dimension_numbers<[1], [0], [0], [1], [0, 0, 1, 1], [], []>} : vector<8x256xbf16>, vector<256x256xbf16>, vector<8x256xf32> -> vector<8x256xf32>
    %c0_92 = arith.constant 0 : index
    %c0_93 = arith.constant 0 : index
    %181 = vector.load %arg5[%c0_92, %c0_93] : memref<1x256xf32, #tpu.memory_space<vmem>>, vector<1x256xf32>
    %182 = vector.broadcast %181 : vector<1x256xf32> to vector<8x256xf32>
    %183 = arith.addf %180, %182 : vector<8x256xf32>
    %184 = arith.negf %183 : vector<8x256xf32>
    %185 = math.exp %184 : vector<8x256xf32>
    %cst_94 = arith.constant 1.000000e+00 : f32
    %186 = vector.broadcast %cst_94 : f32 to vector<8x256xf32>
    %187 = arith.addf %186, %185 : vector<8x256xf32>
    %188 = arith.divf %186, %187 : vector<8x256xf32>
    %189 = vector.extract_strided_slice %188 {offsets = [0, 0], sizes = [8, 128], strides = [1, 1]} : vector<8x256xf32> to vector<8x128xf32>
    %190 = vector.extract_strided_slice %188 {offsets = [0, 128], sizes = [8, 128], strides = [1, 1]} : vector<8x256xf32> to vector<8x128xf32>
    %191 = arith.mulf %164, %190 : vector<8x128xf32>
    %192 = arith.truncf %191 : vector<8x128xf32> to vector<8x128xbf16>
    %c0_95 = arith.constant 0 : index
    %c0_96 = arith.constant 0 : index
    %193 = vector.load %arg3[%c0_95, %c0_96] : memref<128x128xbf16, #tpu.memory_space<vmem>>, vector<128x128xbf16>
    %cst_97 = arith.constant dense<0.000000e+00> : vector<8x128xf32>
    %194 = tpu.matmul %192, %193, %cst_97 {dimension_numbers = #tpu.dot_dimension_numbers<[1], [0], [0], [1], [0, 0, 1, 1], [], []>} : vector<8x128xbf16>, vector<128x128xbf16>, vector<8x128xf32> -> vector<8x128xf32>
    %195 = vector.extract_strided_slice %171 {offsets = [0, 256], sizes = [8, 128], strides = [1, 1]} : vector<8x384xf32> to vector<8x128xf32>
    %196 = arith.addf %194, %195 : vector<8x128xf32>
    %197 = math.tanh %196 : vector<8x128xf32>
    %198 = arith.truncf %197 : vector<8x128xf32> to vector<8x128xbf16>
    %c0_98 = arith.constant 0 : index
    %c0_99 = arith.constant 0 : index
    %199 = vector.load %arg6[%c0_98, %c0_99] : memref<128x128xbf16, #tpu.memory_space<vmem>>, vector<128x128xbf16>
    %cst_100 = arith.constant dense<0.000000e+00> : vector<8x128xf32>
    %200 = tpu.matmul %198, %199, %cst_100 {dimension_numbers = #tpu.dot_dimension_numbers<[1], [0], [0], [1], [0, 0, 1, 1], [], []>} : vector<8x128xbf16>, vector<128x128xbf16>, vector<8x128xf32> -> vector<8x128xf32>
    %c0_101 = arith.constant 0 : index
    %c0_102 = arith.constant 0 : index
    %201 = vector.load %arg7[%c0_101, %c0_102] : memref<1x128xf32, #tpu.memory_space<vmem>>, vector<1x128xf32>
    %202 = vector.broadcast %201 : vector<1x128xf32> to vector<8x128xf32>
    %203 = arith.addf %200, %202 : vector<8x128xf32>
    %204 = arith.subf %164, %203 : vector<8x128xf32>
    %205 = arith.mulf %189, %204 : vector<8x128xf32>
    %206 = arith.addf %203, %205 : vector<8x128xf32>
    %207 = arith.index_cast %c4_i32 : i32 to index
    %c0_103 = arith.constant 0 : index
    %c0_104 = arith.constant 0 : index
    %208 = vector.load %arg8[%207, %c0_103, %c0_104] : memref<6x8x128xf32, #tpu.memory_space<vmem>>, vector<1x8x128xf32>
    %209 = vector.shape_cast %208 : vector<1x8x128xf32> to vector<8x128xf32>
    %210 = vector.shape_cast %206 : vector<8x128xf32> to vector<1x8x128xf32>
    tpu.vector_store %arg8[%207, %c0_103, %c0_104], %210 {strides = array<i32>} : memref<6x8x128xf32, #tpu.memory_space<vmem>>, vector<1x8x128xf32>,
    %c5_i32 = arith.constant 5 : i32
    %211 = arith.index_cast %c5_i32 : i32 to index
    %c0_105 = arith.constant 0 : index
    %c0_106 = arith.constant 0 : index
    %212 = vector.load %arg0[%211, %c0_105, %c0_106] : memref<6x8x384xf32, #tpu.memory_space<vmem>>, vector<1x8x384xf32>
    %213 = vector.shape_cast %212 : vector<1x8x384xf32> to vector<8x384xf32>
    %214 = arith.truncf %206 : vector<8x128xf32> to vector<8x128xbf16>
    %c0_107 = arith.constant 0 : index
    %c0_108 = arith.constant 0 : index
    %215 = vector.load %arg2[%c0_107, %c0_108] : memref<128x256xbf16, #tpu.memory_space<vmem>>, vector<128x256xbf16>
    %cst_109 = arith.constant dense<0.000000e+00> : vector<8x256xf32>
    %216 = tpu.matmul %214, %215, %cst_109 {dimension_numbers = #tpu.dot_dimension_numbers<[1], [0], [0], [1], [0, 0, 1, 1], [], []>} : vector<8x128xbf16>, vector<128x256xbf16>, vector<8x256xf32> -> vector<8x256xf32>
    %217 = vector.extract_strided_slice %213 {offsets = [0, 0], sizes = [8, 256], strides = [1, 1]} : vector<8x384xf32> to vector<8x256xf32>
    %218 = arith.addf %216, %217 : vector<8x256xf32>
    %219 = math.tanh %218 : vector<8x256xf32>
    %220 = arith.truncf %219 : vector<8x256xf32> to vector<8x256xbf16>
    %c0_110 = arith.constant 0 : index
    %c0_111 = arith.constant 0 : index
    %221 = vector.load %arg4[%c0_110, %c0_111] : memref<256x256xbf16, #tpu.memory_space<vmem>>, vector<256x256xbf16>
    %cst_112 = arith.constant dense<0.000000e+00> : vector<8x256xf32>
    %222 = tpu.matmul %220, %221, %cst_112 {dimension_numbers = #tpu.dot_dimension_numbers<[1], [0], [0], [1], [0, 0, 1, 1], [], []>} : vector<8x256xbf16>, vector<256x256xbf16>, vector<8x256xf32> -> vector<8x256xf32>
    %c0_113 = arith.constant 0 : index
    %c0_114 = arith.constant 0 : index
    %223 = vector.load %arg5[%c0_113, %c0_114] : memref<1x256xf32, #tpu.memory_space<vmem>>, vector<1x256xf32>
    %224 = vector.broadcast %223 : vector<1x256xf32> to vector<8x256xf32>
    %225 = arith.addf %222, %224 : vector<8x256xf32>
    %226 = arith.negf %225 : vector<8x256xf32>
    %227 = math.exp %226 : vector<8x256xf32>
    %cst_115 = arith.constant 1.000000e+00 : f32
    %228 = vector.broadcast %cst_115 : f32 to vector<8x256xf32>
    %229 = arith.addf %228, %227 : vector<8x256xf32>
    %230 = arith.divf %228, %229 : vector<8x256xf32>
    %231 = vector.extract_strided_slice %230 {offsets = [0, 0], sizes = [8, 128], strides = [1, 1]} : vector<8x256xf32> to vector<8x128xf32>
    %232 = vector.extract_strided_slice %230 {offsets = [0, 128], sizes = [8, 128], strides = [1, 1]} : vector<8x256xf32> to vector<8x128xf32>
    %233 = arith.mulf %206, %232 : vector<8x128xf32>
    %234 = arith.truncf %233 : vector<8x128xf32> to vector<8x128xbf16>
    %c0_116 = arith.constant 0 : index
    %c0_117 = arith.constant 0 : index
    %235 = vector.load %arg3[%c0_116, %c0_117] : memref<128x128xbf16, #tpu.memory_space<vmem>>, vector<128x128xbf16>
    %cst_118 = arith.constant dense<0.000000e+00> : vector<8x128xf32>
    %236 = tpu.matmul %234, %235, %cst_118 {dimension_numbers = #tpu.dot_dimension_numbers<[1], [0], [0], [1], [0, 0, 1, 1], [], []>} : vector<8x128xbf16>, vector<128x128xbf16>, vector<8x128xf32> -> vector<8x128xf32>
    %237 = vector.extract_strided_slice %213 {offsets = [0, 256], sizes = [8, 128], strides = [1, 1]} : vector<8x384xf32> to vector<8x128xf32>
    %238 = arith.addf %236, %237 : vector<8x128xf32>
    %239 = math.tanh %238 : vector<8x128xf32>
    %240 = arith.truncf %239 : vector<8x128xf32> to vector<8x128xbf16>
    %c0_119 = arith.constant 0 : index
    %c0_120 = arith.constant 0 : index
    %241 = vector.load %arg6[%c0_119, %c0_120] : memref<128x128xbf16, #tpu.memory_space<vmem>>, vector<128x128xbf16>
    %cst_121 = arith.constant dense<0.000000e+00> : vector<8x128xf32>
    %242 = tpu.matmul %240, %241, %cst_121 {dimension_numbers = #tpu.dot_dimension_numbers<[1], [0], [0], [1], [0, 0, 1, 1], [], []>} : vector<8x128xbf16>, vector<128x128xbf16>, vector<8x128xf32> -> vector<8x128xf32>
    %c0_122 = arith.constant 0 : index
    %c0_123 = arith.constant 0 : index
    %243 = vector.load %arg7[%c0_122, %c0_123] : memref<1x128xf32, #tpu.memory_space<vmem>>, vector<1x128xf32>
    %244 = vector.broadcast %243 : vector<1x128xf32> to vector<8x128xf32>
    %245 = arith.addf %242, %244 : vector<8x128xf32>
    %246 = arith.subf %206, %245 : vector<8x128xf32>
    %247 = arith.mulf %231, %246 : vector<8x128xf32>
    %248 = arith.addf %245, %247 : vector<8x128xf32>
    %249 = arith.index_cast %c5_i32 : i32 to index
    %c0_124 = arith.constant 0 : index
    %c0_125 = arith.constant 0 : index
    %250 = vector.load %arg8[%249, %c0_124, %c0_125] : memref<6x8x128xf32, #tpu.memory_space<vmem>>, vector<1x8x128xf32>
    %251 = vector.shape_cast %250 : vector<1x8x128xf32> to vector<8x128xf32>
    %252 = vector.shape_cast %248 : vector<8x128xf32> to vector<1x8x128xf32>
    tpu.vector_store %arg8[%249, %c0_124, %c0_125], %252 {strides = array<i32>} : memref<6x8x128xf32, #tpu.memory_space<vmem>>, vector<1x8x128xf32>,
    %c6_i32 = arith.constant 6 : i32
    return
  }
}

</mosaic_0001>

<bundles_post_ra>
// kernel: tpu_custom_call.1
= control target key start
LH: loop header
LB: loop body
LE: loop exit
PB: predicated region body
PF: predicated region fallthrough
CT: control target
= control target key end

     0   :  { %13 = vsyncpa [#allocation3], 0  ;;  %s6132_s0 = inlined_call_operand.hbm [shape: f32[6,8,384], index: 0, kind: input, shape index: {}]   ;;  %s6133_s1 = inlined_call_operand.hbm [shape: f32[8,128], index: 1, kind: input, shape index: {}]   ;;  %s6134_s2 = inlined_call_operand.hbm [shape: bf16[128,256], index: 2, kind: input, shape index: {}]   ;;  %s6135_s3 = inlined_call_operand.hbm [shape: bf16[128,128], index: 3, kind: input, shape index: {}]   ;;  %s6136_s4 = inlined_call_operand.hbm [shape: bf16[256,256], index: 4, kind: input, shape index: {}]   ;;  %s6137_s5 = inlined_call_operand.vmem [shape: f32[1,256], index: 5, kind: input, shape index: {}]   ;;  %s6138_s6 = inlined_call_operand.hbm [shape: bf16[128,128], index: 6, kind: input, shape index: {}]   ;;  %s6139_s7 = inlined_call_operand.vmem [shape: f32[1,128], index: 7, kind: input, shape index: {}]   ;;  %s6140_s8 = inlined_call_operand.hbm [shape: f32[6,8,128], index: 8, kind: output, shape index: {}]  }
   0x1   :  { %14 = vsyncpa [#allocation6], 0 }
   0x2   :  { %15 = vsyncpa [#allocation9], 0 }
   0x3   :  { %16 = vsyncpa [#allocation12], 0 }
   0x4   :  { %17 = vsyncpa [#allocation4], 0  ;;  %s5206_s27 = smov [#allocation5]   ;;  %s5207_s29 = smov [#allocation8]  }
   0x5   :  { %s36_s28 = sshll.u32 %s5206_s27, 4  ;;  %s57_s30 = sshll.u32 %s5207_s29, 4  ;;  %s37_s28 = int_to_ptr.vmem [resolvable:$true] %s36_s28  ;;  %s58_s30 = int_to_ptr.vmem [resolvable:$true] %s57_s30 }
   0x6   :  { %s5064_s9 = scalar_lea.vmem %s37_s28, 128  ;;  %p5069_p1 = scmp.lt.s32.totalorder %s37_s28, %s37_s28 }
   0x7   :  { %p5065_p0 = scmp.ne.s32.totalorder %s37_s28, %s5064_s9  ;;  %p5070_p2 = scmp.lt.s32.totalorder %s5064_s9, %s5064_s9 }
   0x9   :  { %p5071_p3 = por %p5070_p2, %p5069_p1 }
   0xb   :  { %p5072_p4 = pnand %p5071_p3, %p5065_p0 }
   0xd   :  { %5075 = shalt.err (!%p5072_p4)
}
   0xe   :  { %39 = dma.hbm_to_vmem [thread:$0]  %s6133_s1, 128, %s37_s28, [#allocation6]  }
   0xf   :  { %s5084_s12 = scalar_lea.vmem %s58_s30, 1024  ;;  %p5089_p6 = scmp.lt.s32.totalorder %s58_s30, %s58_s30 }
  0x10   :  { %p5085_p5 = scmp.ne.s32.totalorder %s58_s30, %s5084_s12  ;;  %p5090_p7 = scmp.lt.s32.totalorder %s5084_s12, %s5084_s12 }
  0x12   :  { %p5091_p8 = por %p5090_p7, %p5089_p6 }
  0x14   :  { %p5092_p9 = pnand %p5091_p8, %p5085_p5 }
  0x16   :  { %5095 = shalt.err (!%p5092_p9)
}
  0x17   :  { %s5208_s13 = smov 64   ;;  %s5209_s14 = smov 4  }
  0x18   :  { %63 = dma.hbm_to_vmem [thread:$0]  %s6135_s3, 1024, %s58_s30, [#allocation9], %s5208_s13, %s5208_s13, %s5209_s14  }
  0x19   :  { %s5210_s17 = smov [#allocation2]  }
  0x1a   :  { %s23_s18 = sshll.u32 %s5210_s17, 4  ;;  %s24_s18 = int_to_ptr.vmem [resolvable:$true] %s23_s18 }
  0x1b   :  { %s5104_s1 = scalar_lea.vmem %s24_s18, 2304  ;;  %p5109_p11 = scmp.lt.s32.totalorder %s24_s18, %s24_s18 }
  0x1c   :  { %p5105_p10 = scmp.ne.s32.totalorder %s24_s18, %s5104_s1  ;;  %p5110_p12 = scmp.lt.s32.totalorder %s5104_s1, %s5104_s1 }
  0x1e   :  { %p5111_p13 = por %p5110_p12, %p5109_p11 }
  0x20   :  { %p5112_p0 = pnand %p5111_p13, %p5105_p10 }
  0x22   :  { %5115 = shalt.err (!%p5112_p0)
}
  0x23   :  { %s5211_s19 = smov 384   ;;  %s5212_s20 = smov 24  }
  0x24   :  { %29 = dma.hbm_to_vmem [thread:$0]  %s6132_s0, 2304, %s24_s18, [#allocation3], %s5211_s19, %s5211_s19, %s5212_s20  }
  0x25   :  { %s5213_s23 = smov [#allocation7]  }
  0x26   :  { %s45_s24 = sshll.u32 %s5213_s23, 4  ;;  %s46_s24 = int_to_ptr.vmem [resolvable:$true] %s45_s24 }
  0x27   :  { %s5124_s3 = scalar_lea.vmem %s46_s24, 2048  ;;  %p5129_p2 = scmp.lt.s32.totalorder %s46_s24, %s46_s24 }
  0x28   :  { %p5125_p1 = scmp.ne.s32.totalorder %s46_s24, %s5124_s3  ;;  %p5130_p3 = scmp.lt.s32.totalorder %s5124_s3, %s5124_s3 }
  0x2a   :  { %p5131_p4 = por %p5130_p3, %p5129_p2 }
  0x2c   :  { %p5132_p5 = pnand %p5131_p4, %p5125_p1 }
  0x2e   :  { %5135 = shalt.err (!%p5132_p5)
}
  0x2f   :  { %s5214_s25 = smov 128   ;;  %s5215_s26 = smov 8  }
  0x30   :  { %51 = dma.hbm_to_vmem [thread:$0]  %s6134_s2, 2048, %s46_s24, [#allocation6], %s5214_s25, %s5214_s25, %s5215_s26  }
  0x31   :  { %s5216_s0 = smov [#allocation10]   ;;  %s5217_s30 = smov [#allocation11]  }
  0x32   :  { %s69_s29 = sshll.u32 %s5216_s0, 4  ;;  %s83_s9 = sshll.u32 %s5217_s30, 4  ;;  %s70_s29 = int_to_ptr.vmem [resolvable:$true] %s69_s29  ;;  %s84_s9 = int_to_ptr.vmem [resolvable:$true] %s83_s9 }
  0x33   :  { %s5144_s10 = scalar_lea.vmem %s70_s29, 4096  ;;  %p5149_p7 = scmp.lt.s32.totalorder %s70_s29, %s70_s29 }
  0x34   :  { %p5145_p6 = scmp.ne.s32.totalorder %s70_s29, %s5144_s10  ;;  %p5150_p8 = scmp.lt.s32.totalorder %s5144_s10, %s5144_s10 }
  0x36   :  { %p5151_p9 = por %p5150_p8, %p5149_p7 }
  0x38   :  { %p5152_p10 = pnand %p5151_p9, %p5145_p6 }
  0x3a   :  { %5155 = shalt.err (!%p5152_p10)
}
  0x3b   :  { %75 = dma.hbm_to_vmem [thread:$0]  %s6136_s4, 4096, %s70_s29, [#allocation9], %s5214_s25, %s5214_s25, %s5215_s26  }
  0x3c   :  { %s5164_s2 = scalar_lea.vmem %s84_s9, 1024  ;;  %p5169_p12 = scmp.lt.s32.totalorder %s84_s9, %s84_s9 }
  0x3d   :  { %p5165_p11 = scmp.ne.s32.totalorder %s84_s9, %s5164_s2  ;;  %p5170_p13 = scmp.lt.s32.totalorder %s5164_s2, %s5164_s2 }
  0x3f   :  { %p5171_p0 = por %p5170_p13, %p5169_p12 }
  0x41   :  { %p5172_p1 = pnand %p5171_p0, %p5165_p11 }
  0x43   :  { %5175 = shalt.err (!%p5172_p1)
}
  0x44   :  { %89 = dma.hbm_to_vmem [thread:$0]  %s6138_s6, 1024, %s84_s9, [#allocation12], %s5208_s13, %s5208_s13, %s5209_s14  }
  0x45   :  { %5196 = dma.done.wait [#allocation3], 2304  }
  0x46   :  { %5197 = vsyncadd [#allocation3], 4294964992 }
  0x47   :  { %5198 = dma.done.wait [#allocation6], 2176  }
  0x48   :  { %5199 = vsyncadd [#allocation6], 4294965120 }
  0x49   :  { %5200 = dma.done.wait [#allocation9], 5120  }
  0x4a   :  { %5201 = vsyncadd [#allocation9], 4294962176 }
  0x4b   :  { %5202 = dma.done.wait [#allocation12], 1024  }
  0x4c   :  { %5203 = vsyncadd [#allocation12], 4294966272  ;;  %v6143_v0 = vmov 0   ;;  %v5298_v1 = vld [vmem:[#allocation7 + $0x74] ss:$8 sps:$4 sm:$0xff]   ;;  %v112_v51 = vld [vmem:[#allocation2] sm:$0xff] }
  0x4d   :  { %244 = vmatprep.mubr.bf16.mxu0 %v6143_v0  ;;  %v5300_v2 = vld [vmem:[#allocation7 + $0x70] ss:$8 sps:$4 sm:$0xff]   ;;  %212 = vmatprep.subr.bf16.mxu0 %v5298_v1  ;;  %v5303_v3 = vld [vmem:[#allocation7 + $0x64] ss:$8 sps:$4 sm:$0xff]   ;;  %v5306_v4 = vld [vmem:[#allocation7 + $0x60] ss:$8 sps:$4 sm:$0xff]  }
  0x4e   :  { %213 = vmatpush1.bf16.msra.mxu0 %v5300_v2  ;;  %v5309_v5 = vld [vmem:[#allocation7 + $0x54] ss:$8 sps:$4 sm:$0xff]   ;;  %v5312_v6 = vld [vmem:[#allocation7 + $0x50] ss:$8 sps:$4 sm:$0xff]   ;;  %v5315_v7 = vld [vmem:[#allocation7 + $0x44] ss:$8 sps:$4 sm:$0xff]  }
  0x4f   :  { %214 = vmatprep.subr.bf16.mxu0 %v5303_v3  ;;  %v5317_v8 = vld [vmem:[#allocation7 + $0x40] ss:$8 sps:$4 sm:$0xff]   ;;  %v5319_v9 = vld [vmem:[#allocation7 + $0x34] ss:$8 sps:$4 sm:$0xff]   ;;  %v4684_v11 = vld [vmem:[#allocation10 + $0x70] ss:$8 sps:$4 sm:$0xff]  }
  0x50   :  { %v5322_v10 = vld [vmem:[#allocation10 + $0x74] ss:$8 sps:$4 sm:$0xff]   ;;  %v4685_v12 = vld [vmem:[#allocation10 + $0x64] ss:$8 sps:$4 sm:$0xff]   ;;  %v5326_v13 = vld [vmem:[#allocation7 + $0x30] ss:$8 sps:$4 sm:$0xff]  }
  0x51   :  { %461 = vmatprep.subr.bf16.mxu1 %v5322_v10  ;;  %v5328_v14 = vld [vmem:[#allocation10 + $0x60] ss:$8 sps:$4 sm:$0xff]   ;;  %v5331_v15 = vld [vmem:[#allocation10 + $0x54] ss:$8 sps:$4 sm:$0xff]   ;;  %v5334_v16 = vld [vmem:[#allocation7 + $0x24] ss:$8 sps:$4 sm:$0xff]  }
  0x52   :  { %215 = vmatpush1.bf16.msra.mxu0 %v5306_v4  ;;  %462 = vmatpush1.bf16.msra.mxu1 %v4684_v11  ;;  %v5336_v17 = vld [vmem:[#allocation7 + $0x20] ss:$8 sps:$4 sm:$0xff]   ;;  %v5339_v18 = vld [vmem:[#allocation10 + $0x50] ss:$8 sps:$4 sm:$0xff]   ;;  %v5343_v19 = vld [vmem:[#allocation10 + $0x44] ss:$8 sps:$4 sm:$0xff]  }
  0x53   :  { %216 = vmatprep.subr.bf16.mxu0 %v5309_v5  ;;  %463 = vmatprep.subr.bf16.mxu1 %v4685_v12  ;;  %v5346_v20 = vld [vmem:[#allocation7 + $0x14] ss:$8 sps:$4 sm:$0xff]   ;;  %v5348_v21 = vld [vmem:[#allocation7 + $0x10] ss:$8 sps:$4 sm:$0xff]   ;;  %v5351_v22 = vld [vmem:[#allocation10 + $0x40] ss:$8 sps:$4 sm:$0xff]  }
  0x54   :  { %v5355_v23 = vld [vmem:[#allocation10 + $0x34] ss:$8 sps:$4 sm:$0xff]   ;;  %v5358_v24 = vld [vmem:[#allocation7 + $0x4] ss:$8 sps:$4 sm:$0xff]   ;;  %v5360_v25 = vld [vmem:[#allocation7] ss:$8 sps:$4 sm:$0xff]  }
  0x55   :  { %v5362_v26 = vld [vmem:[#allocation5] sm:$0xff]  ;;  %v5366_v28 = vld [vmem:[#allocation10 + $0x24] ss:$8 sps:$4 sm:$0xff]   ;;  %v5372_v29 = vld [vmem:[#allocation10 + $0x20] ss:$8 sps:$4 sm:$0xff]   ;;  %vm5220_vm0 = vmmov 0  }
  0x56   :  { %217 = vmatpush1.bf16.msra.mxu0 %v5312_v6  ;;  %464 = vmatpush1.bf16.msra.mxu1 %v5328_v14  ;;  %v5364_v27 = vld [vmem:[#allocation10 + $0x30] ss:$8 sps:$4 sm:$0xff]   ;;  %v5374_v30 = vld [vmem:[#allocation10 + $0x14] ss:$8 sps:$4 sm:$0xff]   ;;  %v115_v31 = vpack.c.bf16 %v5362_v26, %v5362_v26  ;;  %v5383_v33 = vld [vmem:[#allocation10 + $0x4] ss:$8 sps:$4 sm:$0xff]  }
  0x57   :  { %218 = vmatprep.subr.bf16.mxu0 %v5315_v7  ;;  %465 = vmatprep.subr.bf16.mxu1 %v5331_v15  ;;  %v5381_v32 = vld [vmem:[#allocation10 + $0x10] ss:$8 sps:$4 sm:$0xff]   ;;  %v5387_v34 = vld [vmem:[#allocation10] ss:$8 sps:$4 sm:$0xff]   ;;  %v5389_v35 = vld [vmem:[#allocation10 + $0xf4] ss:$8 sps:$4 sm:$0xff]  }
  0x58   :  { %v5393_v36 = vld [vmem:[#allocation10 + $0xf0] ss:$8 sps:$4 sm:$0xff]   ;;  %v5395_v37 = vld [vmem:[#allocation10 + $0xe4] ss:$8 sps:$4 sm:$0xff]   ;;  %v5399_v38 = vld [vmem:[#allocation10 + $0xe0] ss:$8 sps:$4 sm:$0xff]  }
  0x59   :  { %v5401_v39 = vld [vmem:[#allocation10 + $0xd4] ss:$8 sps:$4 sm:$0xff]   ;;  %v5405_v40 = vld [vmem:[#allocation10 + $0xd0] ss:$8 sps:$4 sm:$0xff]   ;;  %v5410_v41 = vld [vmem:[#allocation10 + $0xc4] ss:$8 sps:$4 sm:$0xff]  }
  0x5a   :  { %219 = vmatpush1.bf16.msra.mxu0 %v5317_v8  ;;  %466 = vmatpush1.bf16.msra.mxu1 %v5339_v18  ;;  %v5412_v42 = vld [vmem:[#allocation10 + $0xc0] ss:$8 sps:$4 sm:$0xff]   ;;  %v5416_v43 = vld [vmem:[#allocation10 + $0xb4] ss:$8 sps:$4 sm:$0xff]   ;;  %v5418_v44 = vld [vmem:[#allocation10 + $0xb0] ss:$8 sps:$4 sm:$0xff]  }
  0x5b   :  { %220 = vmatprep.subr.bf16.mxu0 %v5319_v9  ;;  %467 = vmatprep.subr.bf16.mxu1 %v5343_v19  ;;  %v5421_v45 = vld [vmem:[#allocation10 + $0xa4] ss:$8 sps:$4 sm:$0xff]   ;;  %v5424_v46 = vld [vmem:[#allocation10 + $0xa0] ss:$8 sps:$4 sm:$0xff]   ;;  %v5426_v47 = vld [vmem:[#allocation10 + $0x94] ss:$8 sps:$4 sm:$0xff]  }
  0x5c   :  { %v5429_v48 = vld [vmem:[#allocation10 + $0x90] ss:$8 sps:$4 sm:$0xff]   ;;  %v5431_v49 = vld [vmem:[#allocation10 + $0x84] ss:$8 sps:$4 sm:$0xff]   ;;  %v5435_v50 = vld [vmem:[#allocation10 + $0x80] ss:$8 sps:$4 sm:$0xff]  }
  0x5d   :  { %v113_v53 = vld [vmem:[#allocation2 + $0x8] sm:$0xff]  ;;  %v4730_v63 = vld [vmem:[#allocation8 + $0x38] sm:$0xff]  }
  0x5e   :  { %221 = vmatpush1.bf16.msra.mxu0 %v5326_v13  ;;  %468 = vmatpush1.bf16.msra.mxu1 %v5351_v22 }
  0x5f   :  { %222 = vmatprep.subr.bf16.mxu0 %v5334_v16  ;;  %469 = vmatprep.subr.bf16.mxu1 %v5355_v23 }
  0x62   :  { %223 = vmatpush1.bf16.msra.mxu0 %v5336_v17  ;;  %470 = vmatpush1.bf16.msra.mxu1 %v5364_v27 }
  0x63   :  { %224 = vmatprep.subr.bf16.mxu0 %v5346_v20  ;;  %471 = vmatprep.subr.bf16.mxu1 %v5366_v28 }
  0x66   :  { %225 = vmatpush1.bf16.msra.mxu0 %v5348_v21  ;;  %472 = vmatpush1.bf16.msra.mxu1 %v5372_v29 }
  0x67   :  { %226 = vmatprep.subr.bf16.mxu0 %v5358_v24  ;;  %473 = vmatprep.subr.bf16.mxu1 %v5374_v30 }
  0x6a   :  { %227 = vmatpush1.bf16.msra.mxu0 %v5360_v25  ;;  %474 = vmatpush1.bf16.msra.mxu1 %v5381_v32 }
  0x6b   :  { %475 = vmatprep.subr.bf16.mxu1 %v5383_v33 }
  0x6d   :  { %245 = vmatmul.mubr.bf16.vlgmr.msra.gmra.mxu0 %v115_v31 }
  0x6e   :  { %476 = vmatpush1.bf16.msra.mxu1 %v5387_v34 }
  0x6f   :  { %477 = vmatprep.subr.bf16.mxu1 %v5389_v35 }
  0x72   :  { %478 = vmatpush2.bf16.msra.mxu1 %v5393_v36 }
  0x73   :  { %479 = vmatprep.subr.bf16.mxu1 %v5395_v37 }
  0x76   :  { %480 = vmatpush2.bf16.msra.mxu1 %v5399_v38 }
  0x77   :  { %481 = vmatprep.subr.bf16.mxu1 %v5401_v39 }
  0x7a   :  { %482 = vmatpush2.bf16.msra.mxu1 %v5405_v40 }
  0x7b   :  { %483 = vmatprep.subr.bf16.mxu1 %v5410_v41 }
  0x7e   :  { %484 = vmatpush2.bf16.msra.mxu1 %v5412_v42 }
  0x7f   :  { %485 = vmatprep.subr.bf16.mxu1 %v5416_v43 }
  0x82   :  { %486 = vmatpush2.bf16.msra.mxu1 %v5418_v44 }
  0x83   :  { %487 = vmatprep.subr.bf16.mxu1 %v5421_v45 }
  0x86   :  { %488 = vmatpush2.bf16.msra.mxu1 %v5424_v46 }
  0x87   :  { %489 = vmatprep.subr.bf16.mxu1 %v5426_v47 }
  0x8a   :  { %490 = vmatpush2.bf16.msra.mxu1 %v5429_v48 }
  0x8b   :  { %491 = vmatprep.subr.bf16.mxu1 %v5431_v49 }
  0x8e   :  { %492 = vmatpush2.bf16.msra.mxu1 %v5435_v50 }
  0x8f   :  { %838 = vmatprep.subr.bf16.mxu1 %v5298_v1  ;;  %v6141_v1 = vmov 0.0  }
  0x90   :  { %4402 = vmatprep.subr.bf16.mxu0 %v6141_v1  ;;  %4418 = vmatprep.mubr.msk.bf16.mxu0 %vm5220_vm0, %v6141_v1 }
  0x91   :  { %4403 = vmatpush3.bf16.msra.mxu0 %v4730_v63  ;;  %v4745_v63 = vld [vmem:[#allocation11] sm:$0xff]  }
  0x92   :  { %4404 = vmatprep.subr.bf16.mxu0 %v6141_v1 }
 0x12d   :  { %v246_v52 = vpop.f32.mrf.mxu0 }
 0x12e   :  { %v247_v54 = vadd.f32 %v246_v52, %v112_v51 }
 0x12f   :  { %v248_v55 = vpop.f32.mrf.mxu0 }
 0x130   :  { %v249_v56 = vadd.f32 %v248_v55, %v113_v53  ;;  %4970 = vtanh.f32 %v247_v54  ;;  %v4738_v55 = vld [vmem:[#allocation11 + $0x38] sm:$0xff]  }
 0x131   :  { %v250_v57 = vpop.f32.mrf.mxu0 }
 0x132   :  { %4972 = vtanh.f32 %v249_v56  ;;  %v4739_v57 = vld [vmem:[#allocation11 + $0x30] sm:$0xff]  }
 0x133   :  { %v251_v58 = vpop.f32.mrf.mxu0 }
 0x134   :  { %v4740_v58 = vld [vmem:[#allocation11 + $0x28] sm:$0xff]  }
 0x13d   :  { %v4971_v59 = vpop.eup %4970 }
 0x13e   :  { %v255_v62 = vpack.c.bf16 %v4971_v59, %v4971_v59  ;;  %v4741_v59 = vld [vmem:[#allocation11 + $0x20] sm:$0xff]  }
 0x13f   :  { %v4973_v60 = vpop.eup %4972 }
 0x140   :  { %v256_v61 = vpack.c.bf16 %v4973_v60, %v4973_v60  ;;  %v4742_v60 = vld [vmem:[#allocation11 + $0x18] sm:$0xff]  }
 0x142   :  { %493 = vmatprep.mubr.bf16.mxu1 %v256_v61  ;;  %v4743_v61 = vld [vmem:[#allocation11 + $0x10] sm:$0xff]  }
 0x143   :  { %494 = vmatmul.mubr.bf16.vlgmr.msra.gmra.mxu1 %v255_v62  ;;  %v4744_v62 = vld [vmem:[#allocation11 + $0x8] sm:$0xff]  }
 0x144   :  { %839 = vmatpush1.bf16.msra.mxu1 %v5300_v2  ;;  %870 = vmatprep.mubr.bf16.mxu1 %v6143_v0  ;;  %v4731_v2 = vld [vmem:[#allocation8 + $0x30] sm:$0xff]  }
 0x145   :  { %840 = vmatprep.subr.bf16.mxu1 %v5303_v3  ;;  %4405 = vmatpush3.bf16.msra.mxu0 %v4731_v2  ;;  %v4732_v3 = vld [vmem:[#allocation8 + $0x28] sm:$0xff]   ;;  %v114_v2 = vld [vmem:[#allocation2 + $0x10] sm:$0xff] }
 0x146   :  { %4406 = vmatprep.subr.bf16.mxu0 %v6141_v1 }
 0x148   :  { %841 = vmatpush1.bf16.msra.mxu1 %v5306_v4  ;;  %v4733_v4 = vld [vmem:[#allocation8 + $0x20] sm:$0xff]  }
 0x149   :  { %842 = vmatprep.subr.bf16.mxu1 %v5309_v5  ;;  %4407 = vmatpush3.bf16.msra.mxu0 %v4732_v3  ;;  %v4734_v5 = vld [vmem:[#allocation8 + $0x18] sm:$0xff]  }
 0x14a   :  { %4408 = vmatprep.subr.bf16.mxu0 %v6141_v1 }
 0x14c   :  { %843 = vmatpush1.bf16.msra.mxu1 %v5312_v6  ;;  %v4735_v6 = vld [vmem:[#allocation8 + $0x10] sm:$0xff]  }
 0x14d   :  { %844 = vmatprep.subr.bf16.mxu1 %v5315_v7  ;;  %4409 = vmatpush3.bf16.msra.mxu0 %v4733_v4  ;;  %v4736_v7 = vld [vmem:[#allocation8 + $0x8] sm:$0xff]  }
 0x14e   :  { %4410 = vmatprep.subr.bf16.mxu0 %v6141_v1 }
 0x150   :  { %845 = vmatpush1.bf16.msra.mxu1 %v5317_v8  ;;  %v4737_v8 = vld [vmem:[#allocation8] sm:$0xff]  }
 0x151   :  { %846 = vmatprep.subr.bf16.mxu1 %v5319_v9  ;;  %4411 = vmatpush3.bf16.msra.mxu0 %v4734_v5  ;;  %v291_v9 = vlaneseq }
 0x152   :  { %4412 = vmatprep.subr.bf16.mxu0 %v6141_v1 }
 0x153   :  { %v5469_v11 = vshrl.u32 %v291_v9, 7 }
 0x154   :  { %847 = vmatpush1.bf16.msra.mxu1 %v5326_v13  ;;  %v5477_v13 = vld [vmem:[%s6137_s5] sm:$0x3] }
 0x155   :  { %848 = vmatprep.subr.bf16.mxu1 %v5334_v16  ;;  %4413 = vmatpush3.bf16.msra.mxu0 %v4735_v6  ;;  %v5472_v12 = vsub.s32 1, %v5469_v11 }
 0x156   :  { %4414 = vmatprep.subr.bf16.mxu0 %v6141_v1 }
 0x157   :  { %v298_v16 = vrot.slane %v5477_v13, %v5472_v12 }
 0x158   :  { %849 = vmatpush1.bf16.msra.mxu1 %v5336_v17 }
 0x159   :  { %850 = vmatprep.subr.bf16.mxu1 %v5346_v20  ;;  %4415 = vmatpush3.bf16.msra.mxu0 %v4736_v7 }
 0x15a   :  { %4416 = vmatprep.subr.bf16.mxu0 %v6141_v1 }
 0x15c   :  { %851 = vmatpush1.bf16.msra.mxu1 %v5348_v21 }
 0x15d   :  { %852 = vmatprep.subr.bf16.mxu1 %v5358_v24  ;;  %4417 = vmatpush3.bf16.msra.mxu0 %v4737_v8 }
 0x15e   :  { %4422 = vmatprep.subr.bf16.mxu0 %v6141_v1 }
 0x160   :  { %853 = vmatpush1.bf16.msra.mxu1 %v5360_v25 }
 0x161   :  { %4442 = vmatprep.subr.bf16.mxu1 %v6141_v1 }
 0x203   :  { %v5481_v17 = vpop.f32.mrf.mxu1 }
 0x205   :  { %v497_v20 = vpop.f32.mrf.mxu1 }
 0x206   :  { %v498_v21 = vadd.f32 %v497_v20, %v298_v16  ;;  %v5054_v16 = vld [vmem:[#allocation10 + $0x70] ss:$8 sps:$4 sm:$0xff]   ;;  %v5055_v20 = vld [vmem:[#allocation10 + $0x64] ss:$8 sps:$4 sm:$0xff]  }
 0x207   :  { %v499_v24 = vpop.f32.mrf.mxu1 }
 0x208   :  { %v3941_v25 = vmul.f32 -1.442695, %v498_v21  ;;  %v4751_v21 = vld [vmem:[#allocation8 + $0x10] sm:$0xff]   ;;  %v4752_v24 = vld [vmem:[#allocation8 + $0x8] sm:$0xff]  }
 0x209   :  { %v500_v31 = vpop.f32.mrf.mxu1 }
 0x20a   :  { %4974 = vpow2.f32 %v3941_v25  ;;  %v4753_v25 = vld [vmem:[#allocation8] sm:$0xff]   ;;  %v5555_v31 = vld [vmem:[%s6137_s5] sm:$0x3] }
 0x217   :  { %v4975_v51 = vpop.eup %4974 }
 0x218   :  { %v509_v52 = vadd.f32 1.0, %v4975_v51  ;;  %v924_v51 = vrot.slane %v5555_v31, %v5472_v12 }
 0x21a   :  { %4976 = vrcp.f32 %v509_v52 }
 0x227   :  { %v4977_v53 = vpop.eup %4976 }
 0x228   :  { %v514_v54 = vmul.f32 %v4977_v53, %v5362_v26 }
 0x22a   :  { %v515_v56 = vpack.c.bf16 %v514_v54, %v514_v54 }
 0x22c   :  { %4419 = vmatmul.mubr.bf16.vlgmr.msra.gmra.mxu0 %v515_v56 }
 0x22d   :  { %4423 = vmatpush3.bf16.msra.mxu0 %v4738_v55  ;;  %4438 = vmatprep.mubr.msk.bf16.mxu0 %vm5220_vm0, %v6141_v1 }
 0x22e   :  { %4424 = vmatprep.subr.bf16.mxu0 %v6141_v1 }
 0x231   :  { %4425 = vmatpush3.bf16.msra.mxu0 %v4739_v57 }
 0x232   :  { %4426 = vmatprep.subr.bf16.mxu0 %v6141_v1 }
 0x235   :  { %4427 = vmatpush3.bf16.msra.mxu0 %v4740_v58 }
 0x236   :  { %4428 = vmatprep.subr.bf16.mxu0 %v6141_v1 }
 0x239   :  { %4429 = vmatpush3.bf16.msra.mxu0 %v4741_v59 }
 0x23a   :  { %4430 = vmatprep.subr.bf16.mxu0 %v6141_v1 }
 0x23d   :  { %4431 = vmatpush3.bf16.msra.mxu0 %v4742_v60 }
 0x23e   :  { %4432 = vmatprep.subr.bf16.mxu0 %v6141_v1 }
 0x241   :  { %4433 = vmatpush3.bf16.msra.mxu0 %v4743_v61 }
 0x242   :  { %4434 = vmatprep.subr.bf16.mxu0 %v6141_v1 }
 0x245   :  { %4435 = vmatpush3.bf16.msra.mxu0 %v4744_v62  ;;  %v4754_v62 = vld [vmem:[#allocation11 + $0x38] sm:$0xff]  }
 0x246   :  { %4436 = vmatprep.subr.bf16.mxu0 %v6141_v1 }
 0x249   :  { %4437 = vmatpush3.bf16.msra.mxu0 %v4745_v63 }
 0x24a   :  { %1087 = vmatprep.subr.bf16.mxu0 %v5322_v10  ;;  %v5524_v10 = vsub.s32 0, %v5469_v11  ;;  %v4748_v11 = vld [vmem:[#allocation8 + $0x28] sm:$0xff]  }
 0x24c   :  { %6146 = vst [vmem:[#allocation19_spill] sm:$0xff] %v5524_v10 }
 0x2ec   :  { %v614_v3 = vpop.f32.mrf.mxu0 }
 0x2ed   :  { %v615_v4 = vadd.f32 %v614_v3, %v114_v2  ;;  %v4755_v2 = vld [vmem:[#allocation11 + $0x30] sm:$0xff]   ;;  %v4756_v3 = vld [vmem:[#allocation11 + $0x28] sm:$0xff]  }
 0x2ee   :  { %v4420_v5 = vpop.f32.mrf.mxu0 }
 0x2ef   :  { %4978 = vtanh.f32 %v615_v4  ;;  %v4757_v4 = vld [vmem:[#allocation11 + $0x20] sm:$0xff]   ;;  %v4758_v5 = vld [vmem:[#allocation11 + $0x18] sm:$0xff]  }
 0x2f0   :  { %v617_v6 = vpop.f32.mrf.mxu0 }
 0x2f1   :  { %v4759_v6 = vld [vmem:[#allocation11 + $0x10] sm:$0xff]  }
 0x2f2   :  { %v4421_v7 = vpop.f32.mrf.mxu0 }
 0x2f3   :  { %v4760_v7 = vld [vmem:[#allocation11 + $0x8] sm:$0xff]  }
 0x2fc   :  { %v4979_v8 = vpop.eup %4978 }
 0x2fd   :  { %v621_v9 = vpack.c.bf16 %v4979_v8, %v4979_v8  ;;  %v4761_v8 = vld [vmem:[#allocation11] sm:$0xff]  }
 0x2ff   :  { %4439 = vmatmul.mubr.bf16.vlgmr.msra.gmra.mxu0 %v621_v9  ;;  %v5571_v9 = vld [vmem:[#allocation7 + $0x70] ss:$8 sps:$4 sm:$0xff]  }
 0x300   :  { %1088 = vmatpush1.bf16.msra.mxu0 %v5054_v16  ;;  %v5573_v16 = vld [vmem:[#allocation7 + $0x74] ss:$8 sps:$4 sm:$0xff]  }
 0x301   :  { %1089 = vmatprep.subr.bf16.mxu0 %v5055_v20  ;;  %v5575_v20 = vld [vmem:[#allocation7 + $0x64] ss:$8 sps:$4 sm:$0xff]  }
 0x304   :  { %1090 = vmatpush1.bf16.msra.mxu0 %v5328_v14  ;;  %v294_v14 = vrot.slane %v5477_v13, %v5524_v10  ;;  %v4749_v13 = vld [vmem:[#allocation8 + $0x20] sm:$0xff]  }
 0x305   :  { %1091 = vmatprep.subr.bf16.mxu0 %v5331_v15 }
 0x306   :  { %v496_v15 = vadd.f32 %v5481_v17, %v294_v14  ;;  %v4750_v17 = vld [vmem:[#allocation8 + $0x18] sm:$0xff]   ;;  %v5579_v14 = vld [vmem:[#allocation7 + $0x60] ss:$8 sps:$4 sm:$0xff]  }
 0x308   :  { %1092 = vmatpush1.bf16.msra.mxu0 %v5339_v18  ;;  %v3940_v18 = vmul.f32 -1.442695, %v496_v15  ;;  %v5582_v15 = vld [vmem:[#allocation7 + $0x54] ss:$8 sps:$4 sm:$0xff]  }
 0x309   :  { %1093 = vmatprep.subr.bf16.mxu0 %v5343_v19 }
 0x30a   :  { %4980 = vpow2.f32 %v3940_v18  ;;  %v5585_v18 = vld [vmem:[#allocation7 + $0x50] ss:$8 sps:$4 sm:$0xff]  }
 0x30c   :  { %1094 = vmatpush1.bf16.msra.mxu0 %v5351_v22 }
 0x30d   :  { %1095 = vmatprep.subr.bf16.mxu0 %v5355_v23  ;;  %v5532_v23 = vld [vmem:[%s6139_s7] ss:$0 sm:$0xff] }
 0x310   :  { %1096 = vmatpush1.bf16.msra.mxu0 %v5364_v27 }
 0x311   :  { %1097 = vmatprep.subr.bf16.mxu0 %v5366_v28 }
 0x314   :  { %1098 = vmatpush1.bf16.msra.mxu0 %v5372_v29 }
 0x315   :  { %1099 = vmatprep.subr.bf16.mxu0 %v5374_v30 }
 0x317   :  { %v4981_v19 = vpop.eup %4980 }
 0x318   :  { %1100 = vmatpush1.bf16.msra.mxu0 %v5381_v32  ;;  %v508_v22 = vadd.f32 1.0, %v4981_v19  ;;  %v5588_v19 = vld [vmem:[#allocation7 + $0x44] ss:$8 sps:$4 sm:$0xff]  }
 0x319   :  { %1101 = vmatprep.subr.bf16.mxu0 %v5383_v33 }
 0x31a   :  { %4982 = vrcp.f32 %v508_v22  ;;  %v5591_v22 = vld [vmem:[#allocation7 + $0x40] ss:$8 sps:$4 sm:$0xff]  }
 0x31c   :  { %1102 = vmatpush1.bf16.msra.mxu0 %v5387_v34 }
 0x31d   :  { %1103 = vmatprep.subr.bf16.mxu0 %v5389_v35 }
 0x320   :  { %1104 = vmatpush2.bf16.msra.mxu0 %v5393_v36 }
 0x321   :  { %1105 = vmatprep.subr.bf16.mxu0 %v5395_v37 }
 0x324   :  { %1106 = vmatpush2.bf16.msra.mxu0 %v5399_v38  ;;  %v738_v38 = vld [vmem:[#allocation2 + $0x18] sm:$0xff] }
 0x325   :  { %1107 = vmatprep.subr.bf16.mxu0 %v5401_v39 }
 0x327   :  { %v4983_v32 = vpop.eup %4982 }
 0x328   :  { %1108 = vmatpush2.bf16.msra.mxu0 %v5405_v40  ;;  %v739_v40 = vld [vmem:[#allocation2 + $0x20] sm:$0xff] }
 0x329   :  { %1109 = vmatprep.subr.bf16.mxu0 %v5410_v41 }
 0x32c   :  { %1110 = vmatpush2.bf16.msra.mxu0 %v5412_v42 }
 0x32d   :  { %1111 = vmatprep.subr.bf16.mxu0 %v5416_v43 }
 0x330   :  { %1112 = vmatpush2.bf16.msra.mxu0 %v5418_v44 }
 0x331   :  { %1113 = vmatprep.subr.bf16.mxu0 %v5421_v45 }
 0x334   :  { %1114 = vmatpush2.bf16.msra.mxu0 %v5424_v46 }
 0x335   :  { %1115 = vmatprep.subr.bf16.mxu0 %v5426_v47 }
 0x338   :  { %1116 = vmatpush2.bf16.msra.mxu0 %v5429_v48 }
 0x339   :  { %1117 = vmatprep.subr.bf16.mxu0 %v5431_v49  ;;  %v4746_v49 = vld [vmem:[#allocation8 + $0x38] sm:$0xff]  }
 0x33c   :  { %1118 = vmatpush2.bf16.msra.mxu0 %v5435_v50  ;;  %v4747_v50 = vld [vmem:[#allocation8 + $0x30] sm:$0xff]  }
 0x33d   :  { %1465 = vmatprep.subr.bf16.mxu0 %v5573_v16 }
 0x3bf   :  { %v727_v27 = vpop.f32.mrf.mxu0 }
 0x3c0   :  { %v728_v28 = vadd.f32 %v5532_v23, %v727_v27  ;;  %v5594_v27 = vld [vmem:[#allocation7 + $0x34] ss:$8 sps:$4 sm:$0xff]  }
 0x3c1   :  { %v4440_v29 = vpop.f32.mrf.mxu0 }
 0x3c2   :  { %v733_v30 = vsub.f32 %v5362_v26, %v728_v28  ;;  %v5600_v29 = vld [vmem:[#allocation7 + $0x24] ss:$8 sps:$4 sm:$0xff]  }
 0x3c3   :  { %v730_v33 = vpop.f32.mrf.mxu0 }
 0x3c4   :  { %v734_v34 = vmul.f32 %v4983_v32, %v733_v30  ;;  %v5603_v30 = vld [vmem:[#allocation7 + $0x20] ss:$8 sps:$4 sm:$0xff]   ;;  %v740_v32 = vld [vmem:[#allocation2 + $0x28] sm:$0xff] }
 0x3c5   :  { %v4441_v35 = vpop.f32.mrf.mxu0 }
 0x3c6   :  { %v5536_v36 = vadd.f32 %v734_v34, %v728_v28  ;;  %v5597_v28 = vld [vmem:[#allocation7 + $0x30] ss:$8 sps:$4 sm:$0xff]  }
 0x3c8   :  { %736 = vst [vmem:[#allocation13] sm:$0xff] %v5536_v36  ;;  %v741_v37 = vpack.c.bf16 %v5536_v36, %v5536_v36 }
 0x3ca   :  { %871 = vmatmul.mubr.bf16.vlgmr.msra.gmra.mxu1 %v741_v37 }
 0x3cb   :  { %4458 = vmatprep.mubr.msk.bf16.mxu1 %vm5220_vm0, %v6141_v1  ;;  %4443 = vmatpush3.bf16.msra.mxu1 %v4746_v49  ;;  %v5634_v49 = vld [vmem:[#allocation10 + $0x50] ss:$8 sps:$4 sm:$0xff]  }
 0x3cc   :  { %4444 = vmatprep.subr.bf16.mxu1 %v6141_v1 }
 0x3cf   :  { %4445 = vmatpush3.bf16.msra.mxu1 %v4747_v50  ;;  %v5637_v50 = vld [vmem:[#allocation10 + $0x44] ss:$8 sps:$4 sm:$0xff]  }
 0x3d0   :  { %4446 = vmatprep.subr.bf16.mxu1 %v6141_v1 }
 0x3d3   :  { %4447 = vmatpush3.bf16.msra.mxu1 %v4748_v11  ;;  %v5640_v11 = vld [vmem:[#allocation10 + $0x40] ss:$8 sps:$4 sm:$0xff]  }
 0x3d4   :  { %4448 = vmatprep.subr.bf16.mxu1 %v6141_v1 }
 0x3d7   :  { %4449 = vmatpush3.bf16.msra.mxu1 %v4749_v13  ;;  %v5643_v13 = vld [vmem:[#allocation10 + $0x34] ss:$8 sps:$4 sm:$0xff]  }
 0x3d8   :  { %4450 = vmatprep.subr.bf16.mxu1 %v6141_v1 }
 0x3db   :  { %4451 = vmatpush3.bf16.msra.mxu1 %v4750_v17  ;;  %v5646_v17 = vld [vmem:[#allocation10 + $0x30] ss:$8 sps:$4 sm:$0xff]  }
 0x3dc   :  { %4452 = vmatprep.subr.bf16.mxu1 %v6141_v1 }
 0x3df   :  { %4453 = vmatpush3.bf16.msra.mxu1 %v4751_v21  ;;  %v5649_v21 = vld [vmem:[#allocation10 + $0x24] ss:$8 sps:$4 sm:$0xff]  }
 0x3e0   :  { %4454 = vmatprep.subr.bf16.mxu1 %v6141_v1 }
 0x3e3   :  { %4455 = vmatpush3.bf16.msra.mxu1 %v4752_v24  ;;  %v5652_v24 = vld [vmem:[#allocation10 + $0x20] ss:$8 sps:$4 sm:$0xff]  }
 0x3e4   :  { %4456 = vmatprep.subr.bf16.mxu1 %v6141_v1 }
 0x3e7   :  { %4457 = vmatpush3.bf16.msra.mxu1 %v4753_v25  ;;  %v5655_v25 = vld [vmem:[#allocation10 + $0x14] ss:$8 sps:$4 sm:$0xff]  }
 0x3e8   :  { %4462 = vmatprep.subr.bf16.mxu1 %v6141_v1 }
 0x48a   :  { %v872_v39 = vpop.f32.mrf.mxu1 }
 0x48b   :  { %v873_v41 = vadd.f32 %v872_v39, %v738_v38 }
 0x48c   :  { %v874_v26 = vpop.f32.mrf.mxu1 }
 0x48d   :  { %v875_v42 = vadd.f32 %v874_v26, %v739_v40  ;;  %4984 = vtanh.f32 %v873_v41  ;;  %v5607_v41 = vld [vmem:[#allocation7 + $0x14] ss:$8 sps:$4 sm:$0xff]   ;;  %v5609_v26 = vld [vmem:[#allocation7 + $0x10] ss:$8 sps:$4 sm:$0xff]  }
 0x48e   :  { %v876_v43 = vpop.f32.mrf.mxu1 }
 0x48f   :  { %4986 = vtanh.f32 %v875_v42  ;;  %v5613_v42 = vld [vmem:[#allocation7 + $0x4] ss:$8 sps:$4 sm:$0xff]   ;;  %v5615_v43 = vld [vmem:[#allocation7] ss:$8 sps:$4 sm:$0xff]  }
 0x490   :  { %v877_v44 = vpop.f32.mrf.mxu1 }
 0x491   :  { %v5620_v44 = vld [vmem:[#allocation10 + $0x70] ss:$8 sps:$4 sm:$0xff]  }
 0x49a   :  { %v4985_v45 = vpop.eup %4984 }
 0x49b   :  { %v881_v48 = vpack.c.bf16 %v4985_v45, %v4985_v45  ;;  %v5622_v45 = vld [vmem:[#allocation10 + $0x74] ss:$8 sps:$4 sm:$0xff]  }
 0x49c   :  { %v4987_v46 = vpop.eup %4986 }
 0x49d   :  { %v882_v47 = vpack.c.bf16 %v4987_v46, %v4987_v46  ;;  %v5624_v46 = vld [vmem:[#allocation10 + $0x64] ss:$8 sps:$4 sm:$0xff]  }
 0x49f   :  { %1119 = vmatprep.mubr.bf16.mxu0 %v882_v47  ;;  %v5628_v47 = vld [vmem:[#allocation10 + $0x60] ss:$8 sps:$4 sm:$0xff]  }
 0x4a0   :  { %1120 = vmatmul.mubr.bf16.vlgmr.msra.gmra.mxu0 %v881_v48  ;;  %v5631_v48 = vld [vmem:[#allocation10 + $0x54] ss:$8 sps:$4 sm:$0xff]  }
 0x4a1   :  { %1497 = vmatprep.mubr.bf16.mxu0 %v6143_v0  ;;  %1466 = vmatpush1.bf16.msra.mxu0 %v5571_v9 }
 0x4a2   :  { %1467 = vmatprep.subr.bf16.mxu0 %v5575_v20 }
 0x4a5   :  { %1468 = vmatpush1.bf16.msra.mxu0 %v5579_v14 }
 0x4a6   :  { %1469 = vmatprep.subr.bf16.mxu0 %v5582_v15 }
 0x4a9   :  { %1470 = vmatpush1.bf16.msra.mxu0 %v5585_v18 }
 0x4aa   :  { %1471 = vmatprep.subr.bf16.mxu0 %v5588_v19 }
 0x4ad   :  { %1472 = vmatpush1.bf16.msra.mxu0 %v5591_v22 }
 0x4ae   :  { %1473 = vmatprep.subr.bf16.mxu0 %v5594_v27 }
 0x4b1   :  { %1474 = vmatpush1.bf16.msra.mxu0 %v5597_v28 }
 0x4b2   :  { %1475 = vmatprep.subr.bf16.mxu0 %v5600_v29 }
 0x4b5   :  { %1476 = vmatpush1.bf16.msra.mxu0 %v5603_v30 }
 0x4b6   :  { %1477 = vmatprep.subr.bf16.mxu0 %v5607_v41 }
 0x4b9   :  { %1478 = vmatpush1.bf16.msra.mxu0 %v5609_v26 }
 0x4ba   :  { %1479 = vmatprep.subr.bf16.mxu0 %v5613_v42 }
 0x4bd   :  { %1480 = vmatpush1.bf16.msra.mxu0 %v5615_v43 }
 0x4be   :  { %4482 = vmatprep.subr.bf16.mxu0 %v6141_v1 }
 0x560   :  { %v5559_v52 = vpop.f32.mrf.mxu0 }
 0x562   :  { %v1123_v53 = vpop.f32.mrf.mxu0 }
 0x563   :  { %v1124_v54 = vadd.f32 %v1123_v53, %v924_v51  ;;  %v5658_v51 = vld [vmem:[#allocation10 + $0x10] ss:$8 sps:$4 sm:$0xff]   ;;  %v5661_v53 = vld [vmem:[#allocation10 + $0x4] ss:$8 sps:$4 sm:$0xff]  }
 0x564   :  { %v1125_v55 = vpop.f32.mrf.mxu0 }
 0x565   :  { %v4008_v56 = vmul.f32 -1.442695, %v1124_v54  ;;  %v5664_v54 = vld [vmem:[#allocation10] ss:$8 sps:$4 sm:$0xff]   ;;  %v5667_v55 = vld [vmem:[#allocation10 + $0xf4] ss:$8 sps:$4 sm:$0xff]  }
 0x566   :  { %v1126_v57 = vpop.f32.mrf.mxu0 }
 0x567   :  { %4988 = vpow2.f32 %v4008_v56  ;;  %v5670_v56 = vld [vmem:[#allocation10 + $0xf0] ss:$8 sps:$4 sm:$0xff]   ;;  %v5673_v57 = vld [vmem:[#allocation10 + $0xe4] ss:$8 sps:$4 sm:$0xff]  }
 0x574   :  { %v4989_v58 = vpop.eup %4988 }
 0x575   :  { %v1135_v59 = vadd.f32 1.0, %v4989_v58  ;;  %v5676_v58 = vld [vmem:[#allocation10 + $0xe0] ss:$8 sps:$4 sm:$0xff]  }
 0x577   :  { %4990 = vrcp.f32 %v1135_v59  ;;  %v5679_v59 = vld [vmem:[#allocation10 + $0xd4] ss:$8 sps:$4 sm:$0xff]  }
 0x584   :  { %v4991_v60 = vpop.eup %4990 }
 0x585   :  { %v1140_v61 = vmul.f32 %v4991_v60, %v5536_v36  ;;  %v5682_v60 = vld [vmem:[#allocation10 + $0xd0] ss:$8 sps:$4 sm:$0xff]  }
 0x587   :  { %v1141_v63 = vpack.c.bf16 %v1140_v61, %v1140_v61  ;;  %v920_v61 = vrot.slane %v5555_v31, %v5524_v10 }
 0x589   :  { %4459 = vmatmul.mubr.bf16.vlgmr.msra.gmra.mxu1 %v1141_v63 }
 0x58a   :  { %4463 = vmatpush3.bf16.msra.mxu1 %v4754_v62  ;;  %4478 = vmatprep.mubr.msk.bf16.mxu1 %vm5220_vm0, %v6141_v1  ;;  %v1122_v62 = vadd.f32 %v5559_v52, %v920_v61  ;;  %v5698_v52 = vld [vmem:[#allocation10 + $0xc4] ss:$8 sps:$4 sm:$0xff]   ;;  %v5718_v61 = vld [vmem:[#allocation10 + $0x90] ss:$8 sps:$4 sm:$0xff]  }
 0x58b   :  { %4464 = vmatprep.subr.bf16.mxu1 %v6141_v1 }
 0x58c   :  { %v4007_v63 = vmul.f32 -1.442695, %v1122_v62  ;;  %v5722_v62 = vld [vmem:[#allocation10 + $0x84] ss:$8 sps:$4 sm:$0xff]  }
 0x58e   :  { %4465 = vmatpush3.bf16.msra.mxu1 %v4755_v2 }
 0x58f   :  { %4466 = vmatprep.subr.bf16.mxu1 %v6141_v1 }
 0x592   :  { %4467 = vmatpush3.bf16.msra.mxu1 %v4756_v3 }
 0x593   :  { %4468 = vmatprep.subr.bf16.mxu1 %v6141_v1 }
 0x596   :  { %4469 = vmatpush3.bf16.msra.mxu1 %v4757_v4 }
 0x597   :  { %4470 = vmatprep.subr.bf16.mxu1 %v6141_v1 }
 0x59a   :  { %4471 = vmatpush3.bf16.msra.mxu1 %v4758_v5 }
 0x59b   :  { %4472 = vmatprep.subr.bf16.mxu1 %v6141_v1 }
 0x59e   :  { %4473 = vmatpush3.bf16.msra.mxu1 %v4759_v6 }
 0x59f   :  { %4474 = vmatprep.subr.bf16.mxu1 %v6141_v1 }
 0x5a2   :  { %4475 = vmatpush3.bf16.msra.mxu1 %v4760_v7 }
 0x5a3   :  { %4476 = vmatprep.subr.bf16.mxu1 %v6141_v1 }
 0x5a6   :  { %4477 = vmatpush3.bf16.msra.mxu1 %v4761_v8 }
 0x5a7   :  { %1714 = vmatprep.subr.bf16.mxu1 %v5622_v45 }
 0x649   :  { %v1240_v33 = vpop.f32.mrf.mxu1 }
 0x64a   :  { %v1241_v34 = vadd.f32 %v1240_v33, %v740_v32 }
 0x64b   :  { %v4460_v35 = vpop.f32.mrf.mxu1 }
 0x64c   :  { %4992 = vtanh.f32 %v1241_v34 }
 0x64d   :  { %v1243_v37 = vpop.f32.mrf.mxu1  ;;  %4994 = vpow2.f32 %v4007_v63  ;;  %v5724_v63 = vld [vmem:[#allocation10 + $0x80] ss:$8 sps:$4 sm:$0xff]  }
 0x64e   :  { %v5706_v37 = vld [vmem:[#allocation10 + $0xb0] ss:$8 sps:$4 sm:$0xff]  }
 0x64f   :  { %v4461_v38 = vpop.f32.mrf.mxu1 }
 0x650   :  { %v5710_v38 = vld [vmem:[#allocation10 + $0xa4] ss:$8 sps:$4 sm:$0xff]  }
 0x659   :  { %v4993_v39 = vpop.eup %4992 }
 0x65a   :  { %v1247_v40 = vpack.c.bf16 %v4993_v39, %v4993_v39  ;;  %v4995_v2 = vpop.eup %4994  ;;  %v5712_v39 = vld [vmem:[#allocation10 + $0xa0] ss:$8 sps:$4 sm:$0xff]  }
 0x65b   :  { %v1134_v3 = vadd.f32 1.0, %v4995_v2  ;;  %v1365_v2 = vld [vmem:[#allocation2 + $0x30] sm:$0xff] }
 0x65c   :  { %4479 = vmatmul.mubr.bf16.vlgmr.msra.gmra.mxu1 %v1247_v40  ;;  %v5716_v40 = vld [vmem:[#allocation10 + $0x94] ss:$8 sps:$4 sm:$0xff]  }
 0x65d   :  { %1715 = vmatpush1.bf16.msra.mxu1 %v5620_v44  ;;  %4996 = vrcp.f32 %v1134_v3 }
 0x65e   :  { %1716 = vmatprep.subr.bf16.mxu1 %v5624_v46 }
 0x661   :  { %1717 = vmatpush1.bf16.msra.mxu1 %v5628_v47 }
 0x662   :  { %1718 = vmatprep.subr.bf16.mxu1 %v5631_v48 }
 0x665   :  { %1719 = vmatpush1.bf16.msra.mxu1 %v5634_v49 }
 0x666   :  { %1720 = vmatprep.subr.bf16.mxu1 %v5637_v50 }
 0x669   :  { %1721 = vmatpush1.bf16.msra.mxu1 %v5640_v11 }
 0x66a   :  { %1722 = vmatprep.subr.bf16.mxu1 %v5643_v13  ;;  %v4997_v8 = vpop.eup %4996 }
 0x66d   :  { %1723 = vmatpush1.bf16.msra.mxu1 %v5646_v17 }
 0x66e   :  { %1724 = vmatprep.subr.bf16.mxu1 %v5649_v21 }
 0x671   :  { %1725 = vmatpush1.bf16.msra.mxu1 %v5652_v24 }
 0x672   :  { %1726 = vmatprep.subr.bf16.mxu1 %v5655_v25 }
 0x675   :  { %1727 = vmatpush1.bf16.msra.mxu1 %v5658_v51 }
 0x676   :  { %1728 = vmatprep.subr.bf16.mxu1 %v5661_v53 }
 0x679   :  { %1729 = vmatpush1.bf16.msra.mxu1 %v5664_v54 }
 0x67a   :  { %1730 = vmatprep.subr.bf16.mxu1 %v5667_v55 }
 0x67d   :  { %1731 = vmatpush2.bf16.msra.mxu1 %v5670_v56 }
 0x67e   :  { %1732 = vmatprep.subr.bf16.mxu1 %v5673_v57 }
 0x681   :  { %1733 = vmatpush2.bf16.msra.mxu1 %v5676_v58 }
 0x682   :  { %1734 = vmatprep.subr.bf16.mxu1 %v5679_v59 }
 0x685   :  { %1735 = vmatpush2.bf16.msra.mxu1 %v5682_v60 }
 0x686   :  { %1736 = vmatprep.subr.bf16.mxu1 %v5698_v52 }
 0x71c   :  { %v1353_v4 = vpop.f32.mrf.mxu1 }
 0x71d   :  { %v1354_v5 = vadd.f32 %v5532_v23, %v1353_v4  ;;  %v5700_v23 = vld [vmem:[#allocation10 + $0xc0] ss:$8 sps:$4 sm:$0xff]  }
 0x71e   :  { %v4480_v6 = vpop.f32.mrf.mxu1  ;;  %1737 = vmatpush2.bf16.msra.mxu1 %v5700_v23  ;;  %v1366_v4 = vld [vmem:[#allocation2 + $0x38] sm:$0xff] }
 0x71f   :  { %v1359_v7 = vsub.f32 %v5536_v36, %v1354_v5  ;;  %v5704_v36 = vld [vmem:[#allocation10 + $0xb4] ss:$8 sps:$4 sm:$0xff]  }
 0x720   :  { %v1356_v32 = vpop.f32.mrf.mxu1  ;;  %1738 = vmatprep.subr.bf16.mxu1 %v5704_v36 }
 0x721   :  { %v1360_v33 = vmul.f32 %v4997_v8, %v1359_v7 }
 0x722   :  { %v4481_v34 = vpop.f32.mrf.mxu1  ;;  %1739 = vmatpush2.bf16.msra.mxu1 %v5706_v37 }
 0x723   :  { %v5691_v35 = vadd.f32 %v1360_v33, %v1354_v5  ;;  %1740 = vmatprep.subr.bf16.mxu1 %v5710_v38 }
 0x725   :  { %1363 = vst [vmem:[#allocation13 + $0x8] sm:$0xff] %v5691_v35  ;;  %v1368_v31 = vpack.c.bf16 %v5691_v35, %v5691_v35 }
 0x726   :  { %1741 = vmatpush2.bf16.msra.mxu1 %v5712_v39 }
 0x727   :  { %1498 = vmatmul.mubr.bf16.vlgmr.msra.gmra.mxu0 %v1368_v31  ;;  %1742 = vmatprep.subr.bf16.mxu1 %v5716_v40 }
 0x728   :  { %4498 = vmatprep.mubr.msk.bf16.mxu0 %vm5220_vm0, %v6141_v1 }
 0x72a   :  { %1743 = vmatpush2.bf16.msra.mxu1 %v5718_v61 }
 0x72b   :  { %1744 = vmatprep.subr.bf16.mxu1 %v5722_v62 }
 0x72e   :  { %1745 = vmatpush2.bf16.msra.mxu1 %v5724_v63 }
 0x72f   :  { %2092 = vmatprep.subr.bf16.mxu1 %v5573_v16  ;;  %v4835_v16 = vld [vmem:[#allocation8 + $0x30] sm:$0xff]  }
 0x7e7   :  { %v1499_v3 = vpop.f32.mrf.mxu0 }
 0x7e8   :  { %v1500_v5 = vadd.f32 %v1499_v3, %v1365_v2 }
 0x7e9   :  { %v1501_v6 = vpop.f32.mrf.mxu0 }
 0x7ea   :  { %v1502_v7 = vadd.f32 %v1501_v6, %v1366_v4  ;;  %4998 = vtanh.f32 %v1500_v5  ;;  %v4842_v6 = vld [vmem:[#allocation11 + $0x38] sm:$0xff]  }
 0x7eb   :  { %v1503_v8 = vpop.f32.mrf.mxu0 }
 0x7ec   :  { %5000 = vtanh.f32 %v1502_v7  ;;  %v4843_v8 = vld [vmem:[#allocation11 + $0x30] sm:$0xff]  }
 0x7ed   :  { %v1504_v32 = vpop.f32.mrf.mxu0 }
 0x7ee   :  { %v4844_v32 = vld [vmem:[#allocation11 + $0x28] sm:$0xff]  }
 0x7f7   :  { %v4999_v33 = vpop.eup %4998 }
 0x7f8   :  { %v1508_v1 = vpack.c.bf16 %v4999_v33, %v4999_v33  ;;  %v4845_v33 = vld [vmem:[#allocation11 + $0x20] sm:$0xff]  }
 0x7f9   :  { %v5001_v34 = vpop.eup %5000 }
 0x7fa   :  { %v1509_v31 = vpack.c.bf16 %v5001_v34, %v5001_v34  ;;  %v4846_v34 = vld [vmem:[#allocation11 + $0x18] sm:$0xff]  }
 0x7fc   :  { %1746 = vmatprep.mubr.bf16.mxu1 %v1509_v31  ;;  %v4847_v31 = vld [vmem:[#allocation11 + $0x10] sm:$0xff]  }
 0x7fd   :  { %1747 = vmatmul.mubr.bf16.vlgmr.msra.gmra.mxu1 %v1508_v1  ;;  %v6147_v1 = vmov 0.0  }
 0x7fe   :  { %2093 = vmatpush1.bf16.msra.mxu1 %v5571_v9  ;;  %2124 = vmatprep.mubr.bf16.mxu1 %v6143_v0  ;;  %v4834_v9 = vld [vmem:[#allocation8 + $0x38] sm:$0xff]  }
 0x7ff   :  { %2094 = vmatprep.subr.bf16.mxu1 %v5575_v20  ;;  %4483 = vmatpush3.bf16.msra.mxu0 %v4834_v9  ;;  %v4836_v20 = vld [vmem:[#allocation8 + $0x28] sm:$0xff]  }
 0x800   :  { %4484 = vmatprep.subr.bf16.mxu0 %v6147_v1  ;;  %v4848_v9 = vld [vmem:[#allocation11 + $0x8] sm:$0xff]  }
 0x802   :  { %2095 = vmatpush1.bf16.msra.mxu1 %v5579_v14  ;;  %v4837_v14 = vld [vmem:[#allocation8 + $0x20] sm:$0xff]  }
 0x803   :  { %2096 = vmatprep.subr.bf16.mxu1 %v5582_v15  ;;  %4485 = vmatpush3.bf16.msra.mxu0 %v4835_v16  ;;  %v4838_v15 = vld [vmem:[#allocation8 + $0x18] sm:$0xff]   ;;  %v4849_v16 = vld [vmem:[#allocation11] sm:$0xff]  }
 0x804   :  { %4486 = vmatprep.subr.bf16.mxu0 %v6147_v1 }
 0x806   :  { %2097 = vmatpush1.bf16.msra.mxu1 %v5585_v18  ;;  %v4839_v18 = vld [vmem:[#allocation8 + $0x10] sm:$0xff]  }
 0x807   :  { %2098 = vmatprep.subr.bf16.mxu1 %v5588_v19  ;;  %4487 = vmatpush3.bf16.msra.mxu0 %v4836_v20  ;;  %v4840_v19 = vld [vmem:[#allocation8 + $0x8] sm:$0xff]  }
 0x808   :  { %4488 = vmatprep.subr.bf16.mxu0 %v6147_v1  ;;  %v1367_v20 = vld [vmem:[#allocation2 + $0x40] sm:$0xff] }
 0x80a   :  { %2099 = vmatpush1.bf16.msra.mxu1 %v5591_v22  ;;  %v4841_v22 = vld [vmem:[#allocation8] sm:$0xff]  }
 0x80b   :  { %2100 = vmatprep.subr.bf16.mxu1 %v5594_v27  ;;  %4489 = vmatpush3.bf16.msra.mxu0 %v4837_v14  ;;  %v5757_v27 = vld [vmem:[%s6137_s5] sm:$0x3] }
 0x80c   :  { %4490 = vmatprep.subr.bf16.mxu0 %v6147_v1 }
 0x80e   :  { %2101 = vmatpush1.bf16.msra.mxu1 %v5597_v28  ;;  %v1551_v28 = vrot.slane %v5757_v27, %v5472_v12 }
 0x80f   :  { %2102 = vmatprep.subr.bf16.mxu1 %v5600_v29  ;;  %4491 = vmatpush3.bf16.msra.mxu0 %v4838_v15 }
 0x810   :  { %4492 = vmatprep.subr.bf16.mxu0 %v6147_v1 }
 0x812   :  { %2103 = vmatpush1.bf16.msra.mxu1 %v5603_v30 }
 0x813   :  { %2104 = vmatprep.subr.bf16.mxu1 %v5607_v41  ;;  %4493 = vmatpush3.bf16.msra.mxu0 %v4839_v18 }
 0x814   :  { %4494 = vmatprep.subr.bf16.mxu0 %v6147_v1 }
 0x816   :  { %2105 = vmatpush1.bf16.msra.mxu1 %v5609_v26 }
 0x817   :  { %2106 = vmatprep.subr.bf16.mxu1 %v5613_v42  ;;  %4495 = vmatpush3.bf16.msra.mxu0 %v4840_v19 }
 0x818   :  { %4496 = vmatprep.subr.bf16.mxu0 %v6147_v1 }
 0x81a   :  { %2107 = vmatpush1.bf16.msra.mxu1 %v5615_v43 }
 0x81b   :  { %4522 = vmatprep.subr.bf16.mxu1 %v6147_v1  ;;  %4497 = vmatpush3.bf16.msra.mxu0 %v4841_v22 }
 0x81c   :  { %4502 = vmatprep.subr.bf16.mxu0 %v6147_v1 }
 0x8bd   :  { %v5761_v29 = vpop.f32.mrf.mxu1 }
 0x8bf   :  { %v1750_v30 = vpop.f32.mrf.mxu1 }
 0x8c0   :  { %v1751_v41 = vadd.f32 %v1750_v30, %v1551_v28 }
 0x8c1   :  { %v1752_v26 = vpop.f32.mrf.mxu1 }
 0x8c2   :  { %v4075_v42 = vmul.f32 -1.442695, %v1751_v41  ;;  %v4857_v41 = vld [vmem:[#allocation8] sm:$0xff]   ;;  %v5834_v26 = vld [vmem:[%s6137_s5] sm:$0x3] }
 0x8c3   :  { %v1753_v43 = vpop.f32.mrf.mxu1 }
 0x8c4   :  { %5002 = vpow2.f32 %v4075_v42  ;;  %v2178_v42 = vrot.slane %v5834_v26, %v5472_v12 }
 0x8d1   :  { %v5003_v2 = vpop.eup %5002 }
 0x8d2   :  { %v1762_v3 = vadd.f32 1.0, %v5003_v2 }
 0x8d4   :  { %5004 = vrcp.f32 %v1762_v3 }
 0x8e1   :  { %v5005_v4 = vpop.eup %5004 }
 0x8e2   :  { %v1767_v5 = vmul.f32 %v5005_v4, %v5691_v35 }
 0x8e4   :  { %v1768_v7 = vpack.c.bf16 %v1767_v5, %v1767_v5 }
 0x8e6   :  { %4499 = vmatmul.mubr.bf16.vlgmr.msra.gmra.mxu0 %v1768_v7 }
 0x8e7   :  { %4503 = vmatpush3.bf16.msra.mxu0 %v4842_v6  ;;  %4518 = vmatprep.mubr.msk.bf16.mxu0 %vm5220_vm0, %v6147_v1 }
 0x8e8   :  { %4504 = vmatprep.subr.bf16.mxu0 %v6147_v1 }
 0x8eb   :  { %4505 = vmatpush3.bf16.msra.mxu0 %v4843_v8 }
 0x8ec   :  { %4506 = vmatprep.subr.bf16.mxu0 %v6147_v1 }
 0x8ef   :  { %4507 = vmatpush3.bf16.msra.mxu0 %v4844_v32 }
 0x8f0   :  { %4508 = vmatprep.subr.bf16.mxu0 %v6147_v1 }
 0x8f3   :  { %4509 = vmatpush3.bf16.msra.mxu0 %v4845_v33 }
 0x8f4   :  { %4510 = vmatprep.subr.bf16.mxu0 %v6147_v1 }
 0x8f7   :  { %4511 = vmatpush3.bf16.msra.mxu0 %v4846_v34  ;;  %v4858_v34 = vld [vmem:[#allocation11 + $0x38] sm:$0xff]  }
 0x8f8   :  { %4512 = vmatprep.subr.bf16.mxu0 %v6147_v1 }
 0x8fb   :  { %4513 = vmatpush3.bf16.msra.mxu0 %v4847_v31 }
 0x8fc   :  { %4514 = vmatprep.subr.bf16.mxu0 %v6147_v1 }
 0x8ff   :  { %4515 = vmatpush3.bf16.msra.mxu0 %v4848_v9  ;;  %v4859_v9 = vld [vmem:[#allocation11 + $0x30] sm:$0xff]  }
 0x900   :  { %4516 = vmatprep.subr.bf16.mxu0 %v6147_v1 }
 0x903   :  { %4517 = vmatpush3.bf16.msra.mxu0 %v4849_v16  ;;  %v4860_v16 = vld [vmem:[#allocation11 + $0x28] sm:$0xff]  }
 0x904   :  { %2341 = vmatprep.subr.bf16.mxu0 %v5622_v45 }
 0x9a6   :  { %v1867_v14 = vpop.f32.mrf.mxu0 }
 0x9a7   :  { %v1868_v15 = vadd.f32 %v1867_v14, %v1367_v20  ;;  %v4861_v20 = vld [vmem:[#allocation11 + $0x20] sm:$0xff]   ;;  %v4862_v14 = vld [vmem:[#allocation11 + $0x18] sm:$0xff]  }
 0x9a8   :  { %v4500_v18 = vpop.f32.mrf.mxu0 }
 0x9a9   :  { %5006 = vtanh.f32 %v1868_v15  ;;  %v4863_v15 = vld [vmem:[#allocation11 + $0x10] sm:$0xff]   ;;  %v4864_v18 = vld [vmem:[#allocation11 + $0x8] sm:$0xff]  }
 0x9aa   :  { %v1870_v19 = vpop.f32.mrf.mxu0 }
 0x9ab   :  { %v4865_v19 = vld [vmem:[#allocation11] sm:$0xff]  }
 0x9ac   :  { %v4501_v22 = vpop.f32.mrf.mxu0 }
 0x9ad   :  { %v5850_v22 = vld [vmem:[#allocation7 + $0x70] ss:$8 sps:$4 sm:$0xff]  }
 0x9b6   :  { %v5007_v28 = vpop.eup %5006 }
 0x9b7   :  { %v1874_v30 = vpack.c.bf16 %v5007_v28, %v5007_v28  ;;  %v5852_v28 = vld [vmem:[#allocation7 + $0x74] ss:$8 sps:$4 sm:$0xff]  }
 0x9b9   :  { %4519 = vmatmul.mubr.bf16.vlgmr.msra.gmra.mxu0 %v1874_v30  ;;  %v5854_v30 = vld [vmem:[#allocation7 + $0x64] ss:$8 sps:$4 sm:$0xff]  }
 0x9ba   :  { %2342 = vmatpush1.bf16.msra.mxu0 %v5620_v44  ;;  %v1547_v44 = vrot.slane %v5757_v27, %v5524_v10  ;;  %v4855_v27 = vld [vmem:[#allocation8 + $0x10] sm:$0xff]  }
 0x9bb   :  { %2343 = vmatprep.subr.bf16.mxu0 %v5624_v46 }
 0x9bc   :  { %v1749_v45 = vadd.f32 %v5761_v29, %v1547_v44  ;;  %v4856_v29 = vld [vmem:[#allocation8 + $0x8] sm:$0xff]  }
 0x9bd   :  { %v5858_v44 = vld [vmem:[#allocation7 + $0x60] ss:$8 sps:$4 sm:$0xff]  }
 0x9be   :  { %2344 = vmatpush1.bf16.msra.mxu0 %v5628_v47  ;;  %v4074_v46 = vmul.f32 -1.442695, %v1749_v45  ;;  %v5861_v45 = vld [vmem:[#allocation7 + $0x54] ss:$8 sps:$4 sm:$0xff]  }
 0x9bf   :  { %2345 = vmatprep.subr.bf16.mxu0 %v5631_v48 }
 0x9c0   :  { %5008 = vpow2.f32 %v4074_v46  ;;  %v5864_v46 = vld [vmem:[#allocation7 + $0x50] ss:$8 sps:$4 sm:$0xff]  }
 0x9c2   :  { %2346 = vmatpush1.bf16.msra.mxu0 %v5634_v49  ;;  %v5811_v49 = vld [vmem:[%s6139_s7] ss:$0 sm:$0xff] }
 0x9c3   :  { %2347 = vmatprep.subr.bf16.mxu0 %v5637_v50 }
 0x9c6   :  { %2348 = vmatpush1.bf16.msra.mxu0 %v5640_v11 }
 0x9c7   :  { %2349 = vmatprep.subr.bf16.mxu0 %v5643_v13 }
 0x9ca   :  { %2350 = vmatpush1.bf16.msra.mxu0 %v5646_v17 }
 0x9cb   :  { %2351 = vmatprep.subr.bf16.mxu0 %v5649_v21 }
 0x9cd   :  { %v5009_v47 = vpop.eup %5008 }
 0x9ce   :  { %2352 = vmatpush1.bf16.msra.mxu0 %v5652_v24  ;;  %v1761_v48 = vadd.f32 1.0, %v5009_v47  ;;  %v5867_v47 = vld [vmem:[#allocation7 + $0x44] ss:$8 sps:$4 sm:$0xff]  }
 0x9cf   :  { %2353 = vmatprep.subr.bf16.mxu0 %v5655_v25 }
 0x9d0   :  { %5010 = vrcp.f32 %v1761_v48  ;;  %v5870_v48 = vld [vmem:[#allocation7 + $0x40] ss:$8 sps:$4 sm:$0xff]  }
 0x9d2   :  { %2354 = vmatpush1.bf16.msra.mxu0 %v5658_v51 }
 0x9d3   :  { %2355 = vmatprep.subr.bf16.mxu0 %v5661_v53 }
 0x9d6   :  { %2356 = vmatpush1.bf16.msra.mxu0 %v5664_v54 }
 0x9d7   :  { %2357 = vmatprep.subr.bf16.mxu0 %v5667_v55  ;;  %v1992_v55 = vld [vmem:[#allocation2 + $0x48] sm:$0xff] }
 0x9da   :  { %2358 = vmatpush2.bf16.msra.mxu0 %v5670_v56 }
 0x9db   :  { %2359 = vmatprep.subr.bf16.mxu0 %v5673_v57  ;;  %v1993_v57 = vld [vmem:[#allocation2 + $0x50] sm:$0xff] }
 0x9dd   :  { %v5011_v21 = vpop.eup %5010 }
 0x9de   :  { %2360 = vmatpush2.bf16.msra.mxu0 %v5676_v58 }
 0x9df   :  { %2361 = vmatprep.subr.bf16.mxu0 %v5679_v59 }
 0x9e2   :  { %2362 = vmatpush2.bf16.msra.mxu0 %v5682_v60 }
 0x9e3   :  { %2363 = vmatprep.subr.bf16.mxu0 %v5698_v52 }
 0x9e6   :  { %2364 = vmatpush2.bf16.msra.mxu0 %v5700_v23 }
 0x9e7   :  { %2365 = vmatprep.subr.bf16.mxu0 %v5704_v36 }
 0x9ea   :  { %2366 = vmatpush2.bf16.msra.mxu0 %v5706_v37 }
 0x9eb   :  { %2367 = vmatprep.subr.bf16.mxu0 %v5710_v38 }
 0x9ee   :  { %2368 = vmatpush2.bf16.msra.mxu0 %v5712_v39  ;;  %v4850_v39 = vld [vmem:[#allocation8 + $0x38] sm:$0xff]  }
 0x9ef   :  { %2369 = vmatprep.subr.bf16.mxu0 %v5716_v40  ;;  %v4851_v40 = vld [vmem:[#allocation8 + $0x30] sm:$0xff]  }
 0x9f2   :  { %2370 = vmatpush2.bf16.msra.mxu0 %v5718_v61  ;;  %v4852_v61 = vld [vmem:[#allocation8 + $0x28] sm:$0xff]  }
 0x9f3   :  { %2371 = vmatprep.subr.bf16.mxu0 %v5722_v62  ;;  %v4853_v62 = vld [vmem:[#allocation8 + $0x20] sm:$0xff]  }
 0x9f6   :  { %2372 = vmatpush2.bf16.msra.mxu0 %v5724_v63  ;;  %v4854_v63 = vld [vmem:[#allocation8 + $0x18] sm:$0xff]  }
 0x9f7   :  { %2719 = vmatprep.subr.bf16.mxu0 %v5852_v28 }
 0xa79   :  { %v1980_v50 = vpop.f32.mrf.mxu0 }
 0xa7a   :  { %v1981_v11 = vadd.f32 %v5811_v49, %v1980_v50  ;;  %v5873_v50 = vld [vmem:[#allocation7 + $0x34] ss:$8 sps:$4 sm:$0xff]  }
 0xa7b   :  { %v4520_v13 = vpop.f32.mrf.mxu0 }
 0xa7c   :  { %v1986_v17 = vsub.f32 %v5691_v35, %v1981_v11  ;;  %v5879_v13 = vld [vmem:[#allocation7 + $0x24] ss:$8 sps:$4 sm:$0xff]  }
 0xa7d   :  { %v1983_v24 = vpop.f32.mrf.mxu0 }
 0xa7e   :  { %v1987_v25 = vmul.f32 %v5011_v21, %v1986_v17  ;;  %v5882_v17 = vld [vmem:[#allocation7 + $0x20] ss:$8 sps:$4 sm:$0xff]  }
 0xa7f   :  { %v4521_v51 = vpop.f32.mrf.mxu0  ;;  %v1994_v21 = vld [vmem:[#allocation2 + $0x58] sm:$0xff] }
 0xa80   :  { %v5815_v53 = vadd.f32 %v1987_v25, %v1981_v11  ;;  %v5876_v11 = vld [vmem:[#allocation7 + $0x30] ss:$8 sps:$4 sm:$0xff]  }
 0xa82   :  { %1990 = vst [vmem:[#allocation13 + $0x10] sm:$0xff] %v5815_v53  ;;  %v1995_v54 = vpack.c.bf16 %v5815_v53, %v5815_v53 }
 0xa84   :  { %2125 = vmatmul.mubr.bf16.vlgmr.msra.gmra.mxu1 %v1995_v54 }
 0xa85   :  { %4538 = vmatprep.mubr.msk.bf16.mxu1 %vm5220_vm0, %v6147_v1  ;;  %4523 = vmatpush3.bf16.msra.mxu1 %v4850_v39  ;;  %v5913_v39 = vld [vmem:[#allocation10 + $0x50] ss:$8 sps:$4 sm:$0xff]  }
 0xa86   :  { %4524 = vmatprep.subr.bf16.mxu1 %v6147_v1 }
 0xa89   :  { %4525 = vmatpush3.bf16.msra.mxu1 %v4851_v40  ;;  %v5916_v40 = vld [vmem:[#allocation10 + $0x44] ss:$8 sps:$4 sm:$0xff]  }
 0xa8a   :  { %4526 = vmatprep.subr.bf16.mxu1 %v6147_v1 }
 0xa8d   :  { %4527 = vmatpush3.bf16.msra.mxu1 %v4852_v61  ;;  %v5919_v61 = vld [vmem:[#allocation10 + $0x40] ss:$8 sps:$4 sm:$0xff]  }
 0xa8e   :  { %4528 = vmatprep.subr.bf16.mxu1 %v6147_v1 }
 0xa91   :  { %4529 = vmatpush3.bf16.msra.mxu1 %v4853_v62  ;;  %v5922_v62 = vld [vmem:[#allocation10 + $0x34] ss:$8 sps:$4 sm:$0xff]  }
 0xa92   :  { %4530 = vmatprep.subr.bf16.mxu1 %v6147_v1 }
 0xa95   :  { %4531 = vmatpush3.bf16.msra.mxu1 %v4854_v63  ;;  %v5925_v63 = vld [vmem:[#allocation10 + $0x30] ss:$8 sps:$4 sm:$0xff]  }
 0xa96   :  { %4532 = vmatprep.subr.bf16.mxu1 %v6147_v1 }
 0xa99   :  { %4533 = vmatpush3.bf16.msra.mxu1 %v4855_v27  ;;  %v5928_v27 = vld [vmem:[#allocation10 + $0x24] ss:$8 sps:$4 sm:$0xff]  }
 0xa9a   :  { %4534 = vmatprep.subr.bf16.mxu1 %v6147_v1 }
 0xa9d   :  { %4535 = vmatpush3.bf16.msra.mxu1 %v4856_v29  ;;  %v5931_v29 = vld [vmem:[#allocation10 + $0x20] ss:$8 sps:$4 sm:$0xff]  }
 0xa9e   :  { %4536 = vmatprep.subr.bf16.mxu1 %v6147_v1 }
 0xaa1   :  { %4537 = vmatpush3.bf16.msra.mxu1 %v4857_v41  ;;  %v5934_v41 = vld [vmem:[#allocation10 + $0x14] ss:$8 sps:$4 sm:$0xff]  }
 0xaa2   :  { %4542 = vmatprep.subr.bf16.mxu1 %v6147_v1 }
 0xb44   :  { %v2126_v56 = vpop.f32.mrf.mxu1 }
 0xb45   :  { %v2127_v58 = vadd.f32 %v2126_v56, %v1992_v55 }
 0xb46   :  { %v2128_v59 = vpop.f32.mrf.mxu1 }
 0xb47   :  { %v2129_v60 = vadd.f32 %v2128_v59, %v1993_v57  ;;  %5012 = vtanh.f32 %v2127_v58  ;;  %v5886_v58 = vld [vmem:[#allocation7 + $0x14] ss:$8 sps:$4 sm:$0xff]   ;;  %v5888_v59 = vld [vmem:[#allocation7 + $0x10] ss:$8 sps:$4 sm:$0xff]  }
 0xb48   :  { %v2130_v35 = vpop.f32.mrf.mxu1 }
 0xb49   :  { %5014 = vtanh.f32 %v2129_v60  ;;  %v5892_v60 = vld [vmem:[#allocation7 + $0x4] ss:$8 sps:$4 sm:$0xff]   ;;  %v5894_v35 = vld [vmem:[#allocation7] ss:$8 sps:$4 sm:$0xff]  }
 0xb4a   :  { %v2131_v52 = vpop.f32.mrf.mxu1 }
 0xb4b   :  { %v5899_v52 = vld [vmem:[#allocation10 + $0x70] ss:$8 sps:$4 sm:$0xff]  }
 0xb54   :  { %v5013_v23 = vpop.eup %5012 }
 0xb55   :  { %v2135_v38 = vpack.c.bf16 %v5013_v23, %v5013_v23  ;;  %v5901_v23 = vld [vmem:[#allocation10 + $0x74] ss:$8 sps:$4 sm:$0xff]  }
 0xb56   :  { %v5015_v36 = vpop.eup %5014 }
 0xb57   :  { %v2136_v37 = vpack.c.bf16 %v5015_v36, %v5015_v36  ;;  %v5903_v36 = vld [vmem:[#allocation10 + $0x64] ss:$8 sps:$4 sm:$0xff]  }
 0xb59   :  { %2373 = vmatprep.mubr.bf16.mxu0 %v2136_v37  ;;  %v5907_v37 = vld [vmem:[#allocation10 + $0x60] ss:$8 sps:$4 sm:$0xff]  }
 0xb5a   :  { %2374 = vmatmul.mubr.bf16.vlgmr.msra.gmra.mxu0 %v2135_v38  ;;  %v5910_v38 = vld [vmem:[#allocation10 + $0x54] ss:$8 sps:$4 sm:$0xff]  }
 0xb5b   :  { %2751 = vmatprep.mubr.bf16.mxu0 %v6143_v0  ;;  %2720 = vmatpush1.bf16.msra.mxu0 %v5850_v22 }
 0xb5c   :  { %2721 = vmatprep.subr.bf16.mxu0 %v5854_v30 }
 0xb5f   :  { %2722 = vmatpush1.bf16.msra.mxu0 %v5858_v44 }
 0xb60   :  { %2723 = vmatprep.subr.bf16.mxu0 %v5861_v45 }
 0xb63   :  { %2724 = vmatpush1.bf16.msra.mxu0 %v5864_v46 }
 0xb64   :  { %2725 = vmatprep.subr.bf16.mxu0 %v5867_v47 }
 0xb67   :  { %2726 = vmatpush1.bf16.msra.mxu0 %v5870_v48 }
 0xb68   :  { %2727 = vmatprep.subr.bf16.mxu0 %v5873_v50 }
 0xb6b   :  { %2728 = vmatpush1.bf16.msra.mxu0 %v5876_v11 }
 0xb6c   :  { %2729 = vmatprep.subr.bf16.mxu0 %v5879_v13 }
 0xb6f   :  { %2730 = vmatpush1.bf16.msra.mxu0 %v5882_v17 }
 0xb70   :  { %2731 = vmatprep.subr.bf16.mxu0 %v5886_v58 }
 0xb73   :  { %2732 = vmatpush1.bf16.msra.mxu0 %v5888_v59 }
 0xb74   :  { %2733 = vmatprep.subr.bf16.mxu0 %v5892_v60 }
 0xb77   :  { %2734 = vmatpush1.bf16.msra.mxu0 %v5894_v35 }
 0xb78   :  { %4562 = vmatprep.subr.bf16.mxu0 %v6147_v1 }
 0xc1a   :  { %v5838_v43 = vpop.f32.mrf.mxu0 }
 0xc1c   :  { %v2377_v2 = vpop.f32.mrf.mxu0 }
 0xc1d   :  { %v2378_v3 = vadd.f32 %v2377_v2, %v2178_v42  ;;  %v5937_v42 = vld [vmem:[#allocation10 + $0x10] ss:$8 sps:$4 sm:$0xff]   ;;  %v5940_v2 = vld [vmem:[#allocation10 + $0x4] ss:$8 sps:$4 sm:$0xff]  }
 0xc1e   :  { %v2379_v4 = vpop.f32.mrf.mxu0 }
 0xc1f   :  { %v4142_v5 = vmul.f32 -1.442695, %v2378_v3  ;;  %v5943_v3 = vld [vmem:[#allocation10] ss:$8 sps:$4 sm:$0xff]   ;;  %v5946_v4 = vld [vmem:[#allocation10 + $0xf4] ss:$8 sps:$4 sm:$0xff]  }
 0xc20   :  { %v2380_v6 = vpop.f32.mrf.mxu0 }
 0xc21   :  { %5016 = vpow2.f32 %v4142_v5  ;;  %v5949_v5 = vld [vmem:[#allocation10 + $0xf0] ss:$8 sps:$4 sm:$0xff]   ;;  %v5952_v6 = vld [vmem:[#allocation10 + $0xe4] ss:$8 sps:$4 sm:$0xff]  }
 0xc2e   :  { %v5017_v7 = vpop.eup %5016 }
 0xc2f   :  { %v2389_v8 = vadd.f32 1.0, %v5017_v7  ;;  %v5955_v7 = vld [vmem:[#allocation10 + $0xe0] ss:$8 sps:$4 sm:$0xff]  }
 0xc31   :  { %5018 = vrcp.f32 %v2389_v8  ;;  %v5958_v8 = vld [vmem:[#allocation10 + $0xd4] ss:$8 sps:$4 sm:$0xff]  }
 0xc3e   :  { %v5019_v32 = vpop.eup %5018 }
 0xc3f   :  { %v2394_v33 = vmul.f32 %v5019_v32, %v5815_v53  ;;  %v5961_v32 = vld [vmem:[#allocation10 + $0xd0] ss:$8 sps:$4 sm:$0xff]  }
 0xc41   :  { %v2395_v31 = vpack.c.bf16 %v2394_v33, %v2394_v33  ;;  %v2174_v33 = vrot.slane %v5834_v26, %v5524_v10  ;;  %v6148_v10 = vmov 0  }
 0xc43   :  { %4539 = vmatmul.mubr.bf16.vlgmr.msra.gmra.mxu1 %v2395_v31 }
 0xc44   :  { %4543 = vmatpush3.bf16.msra.mxu1 %v4858_v34  ;;  %4558 = vmatprep.mubr.msk.bf16.mxu1 %vm5220_vm0, %v6147_v1  ;;  %v2376_v34 = vadd.f32 %v5838_v43, %v2174_v33  ;;  %v5977_v43 = vld [vmem:[#allocation10 + $0xc4] ss:$8 sps:$4 sm:$0xff]   ;;  %v5997_v33 = vld [vmem:[#allocation10 + $0x90] ss:$8 sps:$4 sm:$0xff]  }
 0xc45   :  { %4544 = vmatprep.subr.bf16.mxu1 %v6147_v1 }
 0xc46   :  { %v4141_v31 = vmul.f32 -1.442695, %v2376_v34  ;;  %v6001_v34 = vld [vmem:[#allocation10 + $0x84] ss:$8 sps:$4 sm:$0xff]  }
 0xc48   :  { %4545 = vmatpush3.bf16.msra.mxu1 %v4859_v9 }
 0xc49   :  { %4546 = vmatprep.subr.bf16.mxu1 %v6147_v1 }
 0xc4c   :  { %4547 = vmatpush3.bf16.msra.mxu1 %v4860_v16 }
 0xc4d   :  { %4548 = vmatprep.subr.bf16.mxu1 %v6147_v1 }
 0xc50   :  { %4549 = vmatpush3.bf16.msra.mxu1 %v4861_v20 }
 0xc51   :  { %4550 = vmatprep.subr.bf16.mxu1 %v6147_v1 }
 0xc54   :  { %4551 = vmatpush3.bf16.msra.mxu1 %v4862_v14 }
 0xc55   :  { %4552 = vmatprep.subr.bf16.mxu1 %v6147_v1 }
 0xc58   :  { %4553 = vmatpush3.bf16.msra.mxu1 %v4863_v15 }
 0xc59   :  { %4554 = vmatprep.subr.bf16.mxu1 %v6147_v1 }
 0xc5c   :  { %4555 = vmatpush3.bf16.msra.mxu1 %v4864_v18 }
 0xc5d   :  { %4556 = vmatprep.subr.bf16.mxu1 %v6147_v1 }
 0xc60   :  { %4557 = vmatpush3.bf16.msra.mxu1 %v4865_v19 }
 0xc61   :  { %2968 = vmatprep.subr.bf16.mxu1 %v5901_v23 }
 0xd03   :  { %v2494_v24 = vpop.f32.mrf.mxu1 }
 0xd04   :  { %v2495_v25 = vadd.f32 %v2494_v24, %v1994_v21 }
 0xd05   :  { %v4540_v51 = vpop.f32.mrf.mxu1 }
 0xd06   :  { %5020 = vtanh.f32 %v2495_v25 }
 0xd07   :  { %v2497_v54 = vpop.f32.mrf.mxu1  ;;  %5022 = vpow2.f32 %v4141_v31  ;;  %v6003_v31 = vld [vmem:[#allocation10 + $0x80] ss:$8 sps:$4 sm:$0xff]  }
 0xd08   :  { %v5985_v54 = vld [vmem:[#allocation10 + $0xb0] ss:$8 sps:$4 sm:$0xff]  }
 0xd09   :  { %v4541_v55 = vpop.f32.mrf.mxu1 }
 0xd0a   :  { %v5989_v55 = vld [vmem:[#allocation10 + $0xa4] ss:$8 sps:$4 sm:$0xff]  }
 0xd13   :  { %v5021_v56 = vpop.eup %5020 }
 0xd14   :  { %v2501_v57 = vpack.c.bf16 %v5021_v56, %v5021_v56  ;;  %v5023_v9 = vpop.eup %5022  ;;  %v5991_v56 = vld [vmem:[#allocation10 + $0xa0] ss:$8 sps:$4 sm:$0xff]  }
 0xd15   :  { %v2388_v16 = vadd.f32 1.0, %v5023_v9  ;;  %v2619_v9 = vld [vmem:[#allocation2 + $0x60] sm:$0xff] }
 0xd16   :  { %4559 = vmatmul.mubr.bf16.vlgmr.msra.gmra.mxu1 %v2501_v57  ;;  %v5995_v57 = vld [vmem:[#allocation10 + $0x94] ss:$8 sps:$4 sm:$0xff]  }
 0xd17   :  { %2969 = vmatpush1.bf16.msra.mxu1 %v5899_v52  ;;  %5024 = vrcp.f32 %v2388_v16 }
 0xd18   :  { %2970 = vmatprep.subr.bf16.mxu1 %v5903_v36 }
 0xd1b   :  { %2971 = vmatpush1.bf16.msra.mxu1 %v5907_v37 }
 0xd1c   :  { %2972 = vmatprep.subr.bf16.mxu1 %v5910_v38 }
 0xd1f   :  { %2973 = vmatpush1.bf16.msra.mxu1 %v5913_v39 }
 0xd20   :  { %2974 = vmatprep.subr.bf16.mxu1 %v5916_v40 }
 0xd23   :  { %2975 = vmatpush1.bf16.msra.mxu1 %v5919_v61 }
 0xd24   :  { %2976 = vmatprep.subr.bf16.mxu1 %v5922_v62  ;;  %v5025_v19 = vpop.eup %5024 }
 0xd27   :  { %2977 = vmatpush1.bf16.msra.mxu1 %v5925_v63 }
 0xd28   :  { %2978 = vmatprep.subr.bf16.mxu1 %v5928_v27 }
 0xd2b   :  { %2979 = vmatpush1.bf16.msra.mxu1 %v5931_v29 }
 0xd2c   :  { %2980 = vmatprep.subr.bf16.mxu1 %v5934_v41 }
 0xd2f   :  { %2981 = vmatpush1.bf16.msra.mxu1 %v5937_v42 }
 0xd30   :  { %2982 = vmatprep.subr.bf16.mxu1 %v5940_v2 }
 0xd33   :  { %2983 = vmatpush1.bf16.msra.mxu1 %v5943_v3 }
 0xd34   :  { %2984 = vmatprep.subr.bf16.mxu1 %v5946_v4 }
 0xd37   :  { %2985 = vmatpush2.bf16.msra.mxu1 %v5949_v5 }
 0xd38   :  { %2986 = vmatprep.subr.bf16.mxu1 %v5952_v6 }
 0xd3b   :  { %2987 = vmatpush2.bf16.msra.mxu1 %v5955_v7 }
 0xd3c   :  { %2988 = vmatprep.subr.bf16.mxu1 %v5958_v8 }
 0xd3f   :  { %2989 = vmatpush2.bf16.msra.mxu1 %v5961_v32 }
 0xd40   :  { %2990 = vmatprep.subr.bf16.mxu1 %v5977_v43 }
 0xdd6   :  { %v2607_v20 = vpop.f32.mrf.mxu1 }
 0xdd7   :  { %v2608_v14 = vadd.f32 %v5811_v49, %v2607_v20  ;;  %v5979_v49 = vld [vmem:[#allocation10 + $0xc0] ss:$8 sps:$4 sm:$0xff]   ;;  %v2620_v20 = vld [vmem:[#allocation2 + $0x68] sm:$0xff] }
 0xdd8   :  { %v4560_v15 = vpop.f32.mrf.mxu1  ;;  %2991 = vmatpush2.bf16.msra.mxu1 %v5979_v49 }
 0xdd9   :  { %v2613_v18 = vsub.f32 %v5815_v53, %v2608_v14  ;;  %v5983_v53 = vld [vmem:[#allocation10 + $0xb4] ss:$8 sps:$4 sm:$0xff]  }
 0xdda   :  { %v2610_v21 = vpop.f32.mrf.mxu1  ;;  %2992 = vmatprep.subr.bf16.mxu1 %v5983_v53 }
 0xddb   :  { %v2614_v24 = vmul.f32 %v5025_v19, %v2613_v18 }
 0xddc   :  { %v4561_v25 = vpop.f32.mrf.mxu1  ;;  %2993 = vmatpush2.bf16.msra.mxu1 %v5985_v54 }
 0xddd   :  { %v5970_v51 = vadd.f32 %v2614_v24, %v2608_v14  ;;  %2994 = vmatprep.subr.bf16.mxu1 %v5989_v55 }
 0xddf   :  { %2617 = vst [vmem:[#allocation13 + $0x18] sm:$0xff] %v5970_v51  ;;  %v2622_v26 = vpack.c.bf16 %v5970_v51, %v5970_v51 }
 0xde0   :  { %2995 = vmatpush2.bf16.msra.mxu1 %v5991_v56 }
 0xde1   :  { %2752 = vmatmul.mubr.bf16.vlgmr.msra.gmra.mxu0 %v2622_v26  ;;  %2996 = vmatprep.subr.bf16.mxu1 %v5995_v57 }
 0xde2   :  { %4578 = vmatprep.mubr.msk.bf16.mxu0 %vm5220_vm0, %v6147_v1 }
 0xde4   :  { %2997 = vmatpush2.bf16.msra.mxu1 %v5997_v33 }
 0xde5   :  { %2998 = vmatprep.subr.bf16.mxu1 %v6001_v34 }
 0xde8   :  { %2999 = vmatpush2.bf16.msra.mxu1 %v6003_v31 }
 0xde9   :  { %3346 = vmatprep.subr.bf16.mxu1 %v5852_v28  ;;  %v4941_v28 = vld [vmem:[#allocation8 + $0x20] sm:$0xff]  }
 0xea1   :  { %v2753_v16 = vpop.f32.mrf.mxu0 }
 0xea2   :  { %v2754_v14 = vadd.f32 %v2753_v16, %v2619_v9 }
 0xea3   :  { %v2755_v15 = vpop.f32.mrf.mxu0 }
 0xea4   :  { %v2756_v18 = vadd.f32 %v2755_v15, %v2620_v20  ;;  %5026 = vtanh.f32 %v2754_v14  ;;  %v4946_v20 = vld [vmem:[#allocation11 + $0x38] sm:$0xff]   ;;  %v4947_v15 = vld [vmem:[#allocation11 + $0x30] sm:$0xff]  }
 0xea5   :  { %v2757_v19 = vpop.f32.mrf.mxu0 }
 0xea6   :  { %5028 = vtanh.f32 %v2756_v18  ;;  %v4948_v18 = vld [vmem:[#allocation11 + $0x28] sm:$0xff]   ;;  %v4949_v19 = vld [vmem:[#allocation11 + $0x20] sm:$0xff]  }
 0xea7   :  { %v2758_v21 = vpop.f32.mrf.mxu0 }
 0xea8   :  { %v4950_v21 = vld [vmem:[#allocation11 + $0x18] sm:$0xff]  }
 0xeb1   :  { %v5027_v24 = vpop.eup %5026 }
 0xeb2   :  { %v2762_v0 = vpack.c.bf16 %v5027_v24, %v5027_v24  ;;  %v4951_v24 = vld [vmem:[#allocation11 + $0x10] sm:$0xff]  }
 0xeb3   :  { %v5029_v25 = vpop.eup %5028 }
 0xeb4   :  { %v2763_v26 = vpack.c.bf16 %v5029_v25, %v5029_v25  ;;  %v4952_v25 = vld [vmem:[#allocation11 + $0x8] sm:$0xff]  }
 0xeb6   :  { %3000 = vmatprep.mubr.bf16.mxu1 %v2763_v26  ;;  %v4953_v26 = vld [vmem:[#allocation11] sm:$0xff]  }
 0xeb7   :  { %3001 = vmatmul.mubr.bf16.vlgmr.msra.gmra.mxu1 %v2762_v0  ;;  %v4938_v0 = vld [vmem:[#allocation8 + $0x38] sm:$0xff]  }
 0xeb8   :  { %3347 = vmatpush1.bf16.msra.mxu1 %v5850_v22  ;;  %3378 = vmatprep.mubr.bf16.mxu1 %v6148_v10  ;;  %v4939_v10 = vld [vmem:[#allocation8 + $0x30] sm:$0xff]   ;;  %v4940_v22 = vld [vmem:[#allocation8 + $0x28] sm:$0xff]  }
 0xeb9   :  { %3348 = vmatprep.subr.bf16.mxu1 %v5854_v30  ;;  %4563 = vmatpush3.bf16.msra.mxu0 %v4938_v0  ;;  %v4942_v30 = vld [vmem:[#allocation8 + $0x18] sm:$0xff]  }
 0xeba   :  { %4564 = vmatprep.subr.bf16.mxu0 %v6147_v1  ;;  %v2621_v0 = vld [vmem:[#allocation2 + $0x70] sm:$0xff] }
 0xebc   :  { %3349 = vmatpush1.bf16.msra.mxu1 %v5858_v44  ;;  %v4943_v44 = vld [vmem:[#allocation8 + $0x10] sm:$0xff]  }
 0xebd   :  { %3350 = vmatprep.subr.bf16.mxu1 %v5861_v45  ;;  %4565 = vmatpush3.bf16.msra.mxu0 %v4939_v10  ;;  %v4944_v45 = vld [vmem:[#allocation8 + $0x8] sm:$0xff]  }
 0xebe   :  { %4566 = vmatprep.subr.bf16.mxu0 %v6147_v1 }
 0xec0   :  { %3351 = vmatpush1.bf16.msra.mxu1 %v5864_v46  ;;  %v4945_v46 = vld [vmem:[#allocation8] sm:$0xff]  }
 0xec1   :  { %3352 = vmatprep.subr.bf16.mxu1 %v5867_v47  ;;  %4567 = vmatpush3.bf16.msra.mxu0 %v4940_v22  ;;  %v6036_v47 = vld [vmem:[%s6137_s5] sm:$0x3] }
 0xec2   :  { %4568 = vmatprep.subr.bf16.mxu0 %v6147_v1 }
 0xec4   :  { %3353 = vmatpush1.bf16.msra.mxu1 %v5870_v48  ;;  %v2805_v48 = vrot.slane %v6036_v47, %v5472_v12 }
 0xec5   :  { %3354 = vmatprep.subr.bf16.mxu1 %v5873_v50  ;;  %4569 = vmatpush3.bf16.msra.mxu0 %v4941_v28 }
 0xec6   :  { %4570 = vmatprep.subr.bf16.mxu0 %v6147_v1 }
 0xec8   :  { %3355 = vmatpush1.bf16.msra.mxu1 %v5876_v11 }
 0xec9   :  { %3356 = vmatprep.subr.bf16.mxu1 %v5879_v13  ;;  %4571 = vmatpush3.bf16.msra.mxu0 %v4942_v30 }
 0xeca   :  { %4572 = vmatprep.subr.bf16.mxu0 %v6147_v1 }
 0xecc   :  { %3357 = vmatpush1.bf16.msra.mxu1 %v5882_v17 }
 0xecd   :  { %3358 = vmatprep.subr.bf16.mxu1 %v5886_v58  ;;  %4573 = vmatpush3.bf16.msra.mxu0 %v4943_v44 }
 0xece   :  { %4574 = vmatprep.subr.bf16.mxu0 %v6147_v1 }
 0xed0   :  { %3359 = vmatpush1.bf16.msra.mxu1 %v5888_v59 }
 0xed1   :  { %3360 = vmatprep.subr.bf16.mxu1 %v5892_v60  ;;  %4575 = vmatpush3.bf16.msra.mxu0 %v4944_v45 }
 0xed2   :  { %4576 = vmatprep.subr.bf16.mxu0 %v6147_v1 }
 0xed4   :  { %3361 = vmatpush1.bf16.msra.mxu1 %v5894_v35 }
 0xed5   :  { %4602 = vmatprep.subr.bf16.mxu1 %v6147_v1  ;;  %4577 = vmatpush3.bf16.msra.mxu0 %v4945_v46 }
 0xed6   :  { %4582 = vmatprep.subr.bf16.mxu0 %v6147_v1 }
 0xf77   :  { %v6040_v50 = vpop.f32.mrf.mxu1 }
 0xf79   :  { %v3004_v11 = vpop.f32.mrf.mxu1 }
 0xf7a   :  { %v3005_v13 = vadd.f32 %v3004_v11, %v2805_v48  ;;  %v4959_v48 = vld [vmem:[#allocation8 + $0x10] sm:$0xff]   ;;  %v4961_v11 = vld [vmem:[#allocation8] sm:$0xff]  }
 0xf7b   :  { %v3006_v17 = vpop.f32.mrf.mxu1 }
 0xf7c   :  { %v4209_v58 = vmul.f32 -1.442695, %v3005_v13  ;;  %v3423_v13 = vld [vmem:[%s6137_s5] sm:$0x3]  ;;  %s5221_s5 = smov [#allocation13]  }
 0xf7d   :  { %v3007_v59 = vpop.f32.mrf.mxu1  ;;  %v3432_v17 = vrot.slane %v3423_v13, %v5472_v12  ;;  %v4964_v12 = vld [vmem:[#allocation11 + $0x28] sm:$0xff]   ;;  %s3877_s29 = sshll.u32 %s5221_s5, 4  ;;  %s3878_s29 = int_to_ptr.vmem [resolvable:$true] %s3877_s29 }
 0xf7e   :  { %5030 = vpow2.f32 %v4209_v58  ;;  %s5176_s30 = scalar_lea.vmem %s3878_s29, 768  ;;  %p5181_p3 = scmp.lt.s32.totalorder %s3878_s29, %s3878_s29 }
 0xf7f   :  { %p5177_p2 = scmp.ne.s32.totalorder %s3878_s29, %s5176_s30  ;;  %p5182_p4 = scmp.lt.s32.totalorder %s5176_s30, %s5176_s30 }
 0xf81   :  { %p5183_p5 = por %p5182_p4, %p5181_p3 }
 0xf83   :  { %p5184_p6 = pnand %p5183_p5, %p5177_p2 }
 0xf8b   :  { %v5031_v60 = vpop.eup %5030 }
 0xf8c   :  { %v3016_v35 = vadd.f32 1.0, %v5031_v60 }
 0xf8e   :  { %5032 = vrcp.f32 %v3016_v35 }
 0xf9b   :  { %v5033_v9 = vpop.eup %5032 }
 0xf9c   :  { %v3021_v16 = vmul.f32 %v5033_v9, %v5970_v51 }
 0xf9e   :  { %v3022_v14 = vpack.c.bf16 %v3021_v16, %v3021_v16 }
 0xfa0   :  { %4579 = vmatmul.mubr.bf16.vlgmr.msra.gmra.mxu0 %v3022_v14 }
 0xfa1   :  { %4583 = vmatpush3.bf16.msra.mxu0 %v4946_v20  ;;  %4598 = vmatprep.mubr.msk.bf16.mxu0 %vm5220_vm0, %v6147_v1 }
 0xfa2   :  { %4584 = vmatprep.subr.bf16.mxu0 %v6147_v1 }
 0xfa5   :  { %4585 = vmatpush3.bf16.msra.mxu0 %v4947_v15 }
 0xfa6   :  { %4586 = vmatprep.subr.bf16.mxu0 %v6147_v1 }
 0xfa9   :  { %4587 = vmatpush3.bf16.msra.mxu0 %v4948_v18 }
 0xfaa   :  { %4588 = vmatprep.subr.bf16.mxu0 %v6147_v1 }
 0xfad   :  { %4589 = vmatpush3.bf16.msra.mxu0 %v4949_v19  ;;  %v4962_v19 = vld [vmem:[#allocation11 + $0x38] sm:$0xff]  }
 0xfae   :  { %4590 = vmatprep.subr.bf16.mxu0 %v6147_v1 }
 0xfb1   :  { %4591 = vmatpush3.bf16.msra.mxu0 %v4950_v21 }
 0xfb2   :  { %4592 = vmatprep.subr.bf16.mxu0 %v6147_v1 }
 0xfb5   :  { %4593 = vmatpush3.bf16.msra.mxu0 %v4951_v24  ;;  %v4963_v24 = vld [vmem:[#allocation11 + $0x30] sm:$0xff]  }
 0xfb6   :  { %4594 = vmatprep.subr.bf16.mxu0 %v6147_v1 }
 0xfb9   :  { %4595 = vmatpush3.bf16.msra.mxu0 %v4952_v25  ;;  %v4965_v25 = vld [vmem:[#allocation11 + $0x20] sm:$0xff]  }
 0xfba   :  { %4596 = vmatprep.subr.bf16.mxu0 %v6147_v1 }
 0xfbd   :  { %4597 = vmatpush3.bf16.msra.mxu0 %v4953_v26  ;;  %v4966_v26 = vld [vmem:[#allocation11 + $0x18] sm:$0xff]  }
 0xfbe   :  { %3595 = vmatprep.subr.bf16.mxu0 %v5901_v23 }
0x1060   :  { %v3121_v10 = vpop.f32.mrf.mxu0 }
0x1061   :  { %v3122_v22 = vadd.f32 %v3121_v10, %v2621_v0  ;;  %v4967_v0 = vld [vmem:[#allocation11 + $0x10] sm:$0xff]   ;;  %v4968_v10 = vld [vmem:[#allocation11 + $0x8] sm:$0xff]  }
0x1062   :  { %v4580_v28 = vpop.f32.mrf.mxu0 }
0x1063   :  { %5034 = vtanh.f32 %v3122_v22  ;;  %v4969_v22 = vld [vmem:[#allocation11] sm:$0xff]   ;;  %v3248_v28 = vld [vmem:[#allocation2 + $0x88] sm:$0xff] }
0x1064   :  { %v3124_v30 = vpop.f32.mrf.mxu0 }
0x1066   :  { %v4581_v44 = vpop.f32.mrf.mxu0 }
0x1070   :  { %v5035_v45 = vpop.eup %5034 }
0x1071   :  { %v3128_v46 = vpack.c.bf16 %v5035_v45, %v5035_v45 }
0x1073   :  { %4599 = vmatmul.mubr.bf16.vlgmr.msra.gmra.mxu0 %v3128_v46 }
0x1074   :  { %3596 = vmatpush1.bf16.msra.mxu0 %v5899_v52  ;;  %v6149_v52 = vld [vmem:[#allocation19_spill] sm:$0xff] }
0x1075   :  { %3597 = vmatprep.subr.bf16.mxu0 %v5903_v36  ;;  %v2801_v23 = vrot.slane %v6036_v47, %v6149_v52  ;;  %v4958_v47 = vld [vmem:[#allocation8 + $0x18] sm:$0xff]  }
0x1077   :  { %v3003_v36 = vadd.f32 %v6040_v50, %v2801_v23  ;;  %v4960_v50 = vld [vmem:[#allocation8 + $0x8] sm:$0xff]  }
0x1078   :  { %3598 = vmatpush1.bf16.msra.mxu0 %v5907_v37 }
0x1079   :  { %3599 = vmatprep.subr.bf16.mxu0 %v5910_v38  ;;  %v4208_v37 = vmul.f32 -1.442695, %v3003_v36 }
0x107b   :  { %5036 = vpow2.f32 %v4208_v37 }
0x107c   :  { %3600 = vmatpush1.bf16.msra.mxu0 %v5913_v39 }
0x107d   :  { %3601 = vmatprep.subr.bf16.mxu0 %v5916_v40  ;;  %v6090_v40 = vld [vmem:[%s6139_s7] ss:$0 sm:$0xff] }
0x1080   :  { %3602 = vmatpush1.bf16.msra.mxu0 %v5919_v61 }
0x1081   :  { %3603 = vmatprep.subr.bf16.mxu0 %v5922_v62 }
0x1084   :  { %3604 = vmatpush1.bf16.msra.mxu0 %v5925_v63 }
0x1085   :  { %3605 = vmatprep.subr.bf16.mxu0 %v5928_v27 }
0x1088   :  { %3606 = vmatpush1.bf16.msra.mxu0 %v5931_v29  ;;  %v5037_v38 = vpop.eup %5036 }
0x1089   :  { %3607 = vmatprep.subr.bf16.mxu0 %v5934_v41  ;;  %v3015_v39 = vadd.f32 1.0, %v5037_v38  ;;  %v3428_v38 = vrot.slane %v3423_v13, %v6149_v52 }
0x108b   :  { %5038 = vrcp.f32 %v3015_v39 }
0x108c   :  { %3608 = vmatpush1.bf16.msra.mxu0 %v5937_v42 }
0x108d   :  { %3609 = vmatprep.subr.bf16.mxu0 %v5940_v2 }
0x1090   :  { %3610 = vmatpush1.bf16.msra.mxu0 %v5943_v3 }
0x1091   :  { %3611 = vmatprep.subr.bf16.mxu0 %v5946_v4 }
0x1094   :  { %3612 = vmatpush2.bf16.msra.mxu0 %v5949_v5  ;;  %v3246_v5 = vld [vmem:[#allocation2 + $0x78] sm:$0xff] }
0x1095   :  { %3613 = vmatprep.subr.bf16.mxu0 %v5952_v6 }
0x1098   :  { %3614 = vmatpush2.bf16.msra.mxu0 %v5955_v7  ;;  %v5039_v29 = vpop.eup %5038  ;;  %v3247_v7 = vld [vmem:[#allocation2 + $0x80] sm:$0xff] }
0x1099   :  { %3615 = vmatprep.subr.bf16.mxu0 %v5958_v8 }
0x109c   :  { %3616 = vmatpush2.bf16.msra.mxu0 %v5961_v32 }
0x109d   :  { %3617 = vmatprep.subr.bf16.mxu0 %v5977_v43 }
0x10a0   :  { %3618 = vmatpush2.bf16.msra.mxu0 %v5979_v49 }
0x10a1   :  { %3619 = vmatprep.subr.bf16.mxu0 %v5983_v53 }
0x10a4   :  { %3620 = vmatpush2.bf16.msra.mxu0 %v5985_v54 }
0x10a5   :  { %3621 = vmatprep.subr.bf16.mxu0 %v5989_v55 }
0x10a8   :  { %3622 = vmatpush2.bf16.msra.mxu0 %v5991_v56 }
0x10a9   :  { %3623 = vmatprep.subr.bf16.mxu0 %v5995_v57  ;;  %v4954_v57 = vld [vmem:[#allocation8 + $0x38] sm:$0xff]  }
0x10ac   :  { %3624 = vmatpush2.bf16.msra.mxu0 %v5997_v33  ;;  %v4955_v33 = vld [vmem:[#allocation8 + $0x30] sm:$0xff]  }
0x10ad   :  { %3625 = vmatprep.subr.bf16.mxu0 %v6001_v34  ;;  %v4956_v34 = vld [vmem:[#allocation8 + $0x28] sm:$0xff]  }
0x10b0   :  { %3626 = vmatpush2.bf16.msra.mxu0 %v6003_v31  ;;  %v4957_v31 = vld [vmem:[#allocation8 + $0x20] sm:$0xff]  }
0x1133   :  { %v3234_v61 = vpop.f32.mrf.mxu0 }
0x1134   :  { %v3235_v62 = vadd.f32 %v6090_v40, %v3234_v61 }
0x1135   :  { %v4600_v63 = vpop.f32.mrf.mxu0 }
0x1136   :  { %v3240_v27 = vsub.f32 %v5970_v51, %v3235_v62 }
0x1137   :  { %v3237_v41 = vpop.f32.mrf.mxu0 }
0x1138   :  { %v3241_v42 = vmul.f32 %v5039_v29, %v3240_v27 }
0x1139   :  { %v4601_v2 = vpop.f32.mrf.mxu0 }
0x113a   :  { %v6094_v3 = vadd.f32 %v3241_v42, %v3235_v62 }
0x113c   :  { %3244 = vst [vmem:[#allocation13 + $0x20] sm:$0xff] %v6094_v3  ;;  %v3249_v4 = vpack.c.bf16 %v6094_v3, %v6094_v3 }
0x113e   :  { %3379 = vmatmul.mubr.bf16.vlgmr.msra.gmra.mxu1 %v3249_v4 }
0x113f   :  { %4618 = vmatprep.mubr.msk.bf16.mxu1 %vm5220_vm0, %v6147_v1  ;;  %4603 = vmatpush3.bf16.msra.mxu1 %v4954_v57 }
0x1140   :  { %4604 = vmatprep.subr.bf16.mxu1 %v6147_v1 }
0x1143   :  { %4605 = vmatpush3.bf16.msra.mxu1 %v4955_v33 }
0x1144   :  { %4606 = vmatprep.subr.bf16.mxu1 %v6147_v1 }
0x1147   :  { %4607 = vmatpush3.bf16.msra.mxu1 %v4956_v34 }
0x1148   :  { %4608 = vmatprep.subr.bf16.mxu1 %v6147_v1 }
0x114b   :  { %4609 = vmatpush3.bf16.msra.mxu1 %v4957_v31 }
0x114c   :  { %4610 = vmatprep.subr.bf16.mxu1 %v6147_v1 }
0x114f   :  { %4611 = vmatpush3.bf16.msra.mxu1 %v4958_v47 }
0x1150   :  { %4612 = vmatprep.subr.bf16.mxu1 %v6147_v1 }
0x1153   :  { %4613 = vmatpush3.bf16.msra.mxu1 %v4959_v48 }
0x1154   :  { %4614 = vmatprep.subr.bf16.mxu1 %v6147_v1 }
0x1157   :  { %4615 = vmatpush3.bf16.msra.mxu1 %v4960_v50 }
0x1158   :  { %4616 = vmatprep.subr.bf16.mxu1 %v6147_v1 }
0x115b   :  { %4617 = vmatpush3.bf16.msra.mxu1 %v4961_v11 }
0x115c   :  { %4622 = vmatprep.subr.bf16.mxu1 %v6147_v1 }
0x11fe   :  { %v3380_v6 = vpop.f32.mrf.mxu1 }
0x11ff   :  { %v3381_v8 = vadd.f32 %v3380_v6, %v3246_v5 }
0x1200   :  { %v3382_v32 = vpop.f32.mrf.mxu1 }
0x1201   :  { %v3383_v51 = vadd.f32 %v3382_v32, %v3247_v7  ;;  %5040 = vtanh.f32 %v3381_v8 }
0x1202   :  { %v3384_v43 = vpop.f32.mrf.mxu1 }
0x1203   :  { %5042 = vtanh.f32 %v3383_v51 }
0x1204   :  { %v3385_v49 = vpop.f32.mrf.mxu1 }
0x120e   :  { %v5041_v53 = vpop.eup %5040 }
0x120f   :  { %v3389_v56 = vpack.c.bf16 %v5041_v53, %v5041_v53 }
0x1210   :  { %v5043_v54 = vpop.eup %5042 }
0x1211   :  { %v3390_v55 = vpack.c.bf16 %v5043_v54, %v5043_v54 }
0x1213   :  { %3627 = vmatprep.mubr.bf16.mxu0 %v3390_v55 }
0x1214   :  { %3628 = vmatmul.mubr.bf16.vlgmr.msra.gmra.mxu0 %v3389_v56 }
0x12d4   :  { %v3629_v58 = vpop.f32.mrf.mxu0 }
0x12d5   :  { %v3630_v39 = vadd.f32 %v3629_v58, %v3428_v38 }
0x12d6   :  { %v3631_v59 = vpop.f32.mrf.mxu0 }
0x12d7   :  { %v3632_v60 = vadd.f32 %v3631_v59, %v3432_v17  ;;  %v4275_v61 = vmul.f32 -1.442695, %v3630_v39 }
0x12d8   :  { %v3633_v35 = vpop.f32.mrf.mxu0 }
0x12d9   :  { %v4276_v9 = vmul.f32 -1.442695, %v3632_v60 }
0x12da   :  { %v3634_v16 = vpop.f32.mrf.mxu0 }
0x12db   :  { %5044 = vpow2.f32 %v4276_v9 }
0x12e8   :  { %v5045_v20 = vpop.eup %5044 }
0x12e9   :  { %v3643_v14 = vadd.f32 1.0, %v5045_v20 }
0x12eb   :  { %5046 = vrcp.f32 %v3643_v14 }
0x12f8   :  { %v5047_v15 = vpop.eup %5046 }
0x12f9   :  { %v3648_v18 = vmul.f32 %v5047_v15, %v6094_v3 }
0x12fb   :  { %v3649_v21 = vpack.c.bf16 %v3648_v18, %v3648_v18 }
0x12fd   :  { %4619 = vmatmul.mubr.bf16.vlgmr.msra.gmra.mxu1 %v3649_v21 }
0x12fe   :  { %4623 = vmatpush3.bf16.msra.mxu1 %v4962_v19  ;;  %4638 = vmatprep.mubr.msk.bf16.mxu1 %vm5220_vm0, %v6147_v1 }
0x12ff   :  { %4624 = vmatprep.subr.bf16.mxu1 %v6147_v1 }
0x1302   :  { %4625 = vmatpush3.bf16.msra.mxu1 %v4963_v24 }
0x1303   :  { %4626 = vmatprep.subr.bf16.mxu1 %v6147_v1 }
0x1306   :  { %4627 = vmatpush3.bf16.msra.mxu1 %v4964_v12 }
0x1307   :  { %4628 = vmatprep.subr.bf16.mxu1 %v6147_v1 }
0x130a   :  { %4629 = vmatpush3.bf16.msra.mxu1 %v4965_v25 }
0x130b   :  { %4630 = vmatprep.subr.bf16.mxu1 %v6147_v1 }
0x130e   :  { %4631 = vmatpush3.bf16.msra.mxu1 %v4966_v26 }
0x130f   :  { %4632 = vmatprep.subr.bf16.mxu1 %v6147_v1 }
0x1312   :  { %4633 = vmatpush3.bf16.msra.mxu1 %v4967_v0 }
0x1313   :  { %4634 = vmatprep.subr.bf16.mxu1 %v6147_v1 }
0x1316   :  { %4635 = vmatpush3.bf16.msra.mxu1 %v4968_v10 }
0x1317   :  { %4636 = vmatprep.subr.bf16.mxu1 %v6147_v1 }
0x131a   :  { %4637 = vmatpush3.bf16.msra.mxu1 %v4969_v22 }
0x13bd   :  { %v3748_v30 = vpop.f32.mrf.mxu1 }
0x13be   :  { %v3749_v44 = vadd.f32 %v3748_v30, %v3248_v28 }
0x13bf   :  { %v4620_v45 = vpop.f32.mrf.mxu1 }
0x13c0   :  { %5048 = vtanh.f32 %v3749_v44 }
0x13c1   :  { %v3751_v46 = vpop.f32.mrf.mxu1  ;;  %5050 = vpow2.f32 %v4275_v61 }
0x13c3   :  { %v4621_v23 = vpop.f32.mrf.mxu1 }
0x13cd   :  { %v5049_v36 = vpop.eup %5048 }
0x13ce   :  { %v3755_v37 = vpack.c.bf16 %v5049_v36, %v5049_v36  ;;  %v5051_v62 = vpop.eup %5050 }
0x13cf   :  { %v3642_v63 = vadd.f32 1.0, %v5051_v62 }
0x13d0   :  { %4639 = vmatmul.mubr.bf16.vlgmr.msra.gmra.mxu1 %v3755_v37 }
0x13d1   :  { %5052 = vrcp.f32 %v3642_v63 }
0x13de   :  { %v5053_v42 = vpop.eup %5052 }
0x1490   :  { %v3861_v1 = vpop.f32.mrf.mxu1 }
0x1491   :  { %v3862_v27 = vadd.f32 %v6090_v40, %v3861_v1 }
0x1492   :  { %v4640_v29 = vpop.f32.mrf.mxu1 }
0x1493   :  { %v3867_v41 = vsub.f32 %v6094_v3, %v3862_v27 }
0x1494   :  { %v3864_v2 = vpop.f32.mrf.mxu1 }
0x1495   :  { %v3868_v4 = vmul.f32 %v5053_v42, %v3867_v41 }
0x1496   :  { %v4641_v5 = vpop.f32.mrf.mxu1 }
0x1497   :  { %v3869_v6 = vadd.f32 %v3868_v4, %v3862_v27 }
0x1499   :  { %3871 = vst [vmem:[#allocation13 + $0x28] sm:$0xff] %v3869_v6 }
0x149a   :  { %5187 = shalt.err (!%p5184_p6)
}
0x149b   :  { %3883 = dma.vmem_to_hbm [thread:$0]  %s3878_s29, 768, %s6140_s8, [#allocation4], %s5214_s25, %s5214_s25, %s5215_s26  }
0x149c   :  { %5204 = dma.done.wait [#allocation4], 768  }
0x149d   :  { %5205 = vsyncadd [#allocation4], 4294966528 }
0x149e   :  { %3887 = vsyncpa [#allocation3], 1 }
0x149f   :  { %3888 = vsyncpa [#allocation6], 1 }
0x14a0   :  { %3889 = vsyncpa [#allocation9], 1 }
0x14a1   :  { %3890 = vsyncpa [#allocation12], 1 }
0x14a2   :  { %3891 = vsyncpa [#allocation4], 1 }

</bundles_post_ra>
